<compile_context>
chip_gen: v6e
topology: v6e:2x2x1
jax: 0.10.0
libtpu: 0.0.40
codegen_flags: <defaults>
</compile_context>

<pallas_src>
import functools

import jax
import jax.numpy as jnp
from jax.experimental import pallas as pl
from jax.experimental.pallas import tpu as pltpu

BN_EPS = 1e-5


def _make_conv_stats_kernel(k, stride, th, wo, c_out, c_in):
    """Pass 1: conv as K*K shifted matmuls + per-sample per-channel sum / sum-of-squares."""
    tile_m = th * wo

    def kernel(x_ref, w_ref, y_ref, sum_ref, sumsq_ref):
        r = pl.program_id(1)                      # output-row tile index within this sample
        row0 = r * (th * stride)
        acc = jnp.zeros((c_out, tile_m), dtype=jnp.float32)
        for kh in range(k):
            for kw in range(k):
                if stride == 1:
                    rows = pl.ds(row0 + kh, th)
                    cols = pl.ds(kw, wo)
                else:                              # strided window (not exercised in demo)
                    rows = pl.ds(row0 + kh, th, stride)
                    cols = pl.ds(kw, wo, stride)
                xw = x_ref[0, rows, cols, :]       # (th, wo, c_in) bf16 window
                x2d = xw.reshape(tile_m, c_in)     # channels stay on the lane axis
                w_kk = w_ref[kh * k + kw]          # (c_out, c_in) bf16 tap matrix
                acc = acc + jax.lax.dot_general(
                    w_kk, x2d,
                    dimension_numbers=(((1,), (1,)), ((), ())),
                    preferred_element_type=jnp.float32)          # (c_out, tile_m)

        y_ref[0] = acc.astype(y_ref.dtype)         # bf16 intermediate (lane-dense store)

        @pl.when(r == 0)
        def _():                                   # fresh per-sample stat accumulators
            sum_ref[...] = jnp.zeros_like(sum_ref)
            sumsq_ref[...] = jnp.zeros_like(sumsq_ref)

        # Stats reduced from the f32 accumulator (exact w.r.t. the bf16 cast of y).
        sum_ref[0] += jnp.sum(acc, axis=1, keepdims=True)
        sumsq_ref[0] += jnp.sum(acc * acc, axis=1, keepdims=True)

    return kernel


def _bn_hswish_kernel(y_ref, scale_ref, shift_ref, o_ref):
    """Pass 2: z = y*scale + shift; out = z * relu6(z + 3) / 6 (all in f32)."""
    z = y_ref[...].astype(jnp.float32) * scale_ref[...] + shift_ref[...]
    o_ref[...] = (z * jnp.clip(z + 3.0, 0.0, 6.0) * (1.0 / 6.0)).astype(o_ref.dtype)


def _pick_row_tile(ho, wo, target_cols):
    """Largest th dividing ho with th*wo a multiple of 128 and <= target; else full ho."""
    best = None
    for th in range(1, ho + 1):
        if ho % th:
            continue
        cols = th * wo
        if cols % 128 == 0 and cols <= max(target_cols, 128):
            best = th
    return best if best is not None else ho


def _pick_col_tile(total, target):
    """Largest multiple of 128 dividing total and <= target; else full extent."""
    best = None
    t = 128
    while t <= min(total, max(target, 128)):
        if total % t == 0:
            best = t
        t += 128
    return best if best is not None else total


@functools.partial(jax.jit,
                   static_argnames=("filter_size", "stride", "num_groups", "block_m"))
def conv_bn_hswish(x_nchw, conv_weight, bn_gamma, bn_beta,
                   *, filter_size, stride, num_groups=1, block_m=1024):
    """ConvBNLayer.forward. x_nchw: (N, Cin, H, W); conv_weight: (Cout, Cin, K, K)."""
    assert num_groups == 1  # TODO(synk): grouped conv not implemented.

    n, c_in, h, w = x_nchw.shape
    c_out = conv_weight.shape[0]
    k = filter_size
    pad = (k - 1) // 2
    ho = (h + 2 * pad - k) // stride + 1
    wo = (w + 2 * pad - k) // stride + 1
    hw = ho * wo
    hp, wp = h + 2 * pad, w + 2 * pad

    # NCHW -> border-padded NHWC, bf16 MXU operand stream (no K^2 materialization).
    x_nhwc = jnp.transpose(x_nchw, (0, 2, 3, 1)).astype(jnp.bfloat16)
    x_pad = jnp.pad(x_nhwc, ((0, 0), (pad, pad), (pad, pad), (0, 0)))

    # (Cout, Cin, kh, kw) -> (K*K, Cout, Cin): w_t[kh*K+kw] is the (Cout, Cin) tap matrix.
    w_t = jnp.transpose(conv_weight, (2, 3, 0, 1)).reshape(k * k, c_out, c_in)
    w_t = w_t.astype(jnp.bfloat16)

    # ---- Pass-1 tiling: one padded image resident per sample, output-row tiles ----
    th = _pick_row_tile(ho, wo, block_m)
    r_tiles = ho // th
    tile_m = th * wo

    # Derived VMEM budget: double-buffered image / weights / y tile + f32 accumulator.
    est = (2 * hp * wp * c_in * 2 + 2 * k * k * c_out * c_in * 2
           + 2 * c_out * tile_m * 2 + c_out * tile_m * 4 + (1 << 20))
    # Demo shapes resolve to the 32 MiB floor (safe on v5e/v6e/v7x); cap below v6e VMEM.
    vmem_limit = int(min(max(2 * est, 32 * 1024 * 1024), 96 * 1024 * 1024))

    conv_kernel = _make_conv_stats_kernel(k, stride, th, wo, c_out, c_in)
    y, part_sum, part_sumsq = pl.pallas_call(
        conv_kernel,
        out_shape=(
            jax.ShapeDtypeStruct((n, c_out, hw), jnp.bfloat16),   # bf16 conv intermediate
            jax.ShapeDtypeStruct((n, c_out, 1), jnp.float32),     # per-sample sum
            jax.ShapeDtypeStruct((n, c_out, 1), jnp.float32),     # per-sample sum of squares
        ),
        grid=(n, r_tiles),
        in_specs=[
            pl.BlockSpec((1, hp, wp, c_in), lambda i, r: (i, 0, 0, 0)),  # image (resident over r)
            pl.BlockSpec((k * k, c_out, c_in), lambda i, r: (0, 0, 0)),  # weights (resident)
        ],
        out_specs=(
            pl.BlockSpec((1, c_out, tile_m), lambda i, r: (i, 0, r)),    # lane-dense y tile
            pl.BlockSpec((1, c_out, 1), lambda i, r: (i, 0, 0)),
            pl.BlockSpec((1, c_out, 1), lambda i, r: (i, 0, 0)),
        ),
        compiler_params=pltpu.CompilerParams(
            dimension_semantics=("parallel", "arbitrary"),
            vmem_limit_bytes=vmem_limit),
    )(x_pad, w_t)

    # ---- Tiny finalize in plain JAX: batch mean/var -> fused scale/shift ----
    count = n * hw
    s1 = jnp.sum(part_sum, axis=0)                         # (Cout, 1)
    s2 = jnp.sum(part_sumsq, axis=0)
    mean = s1 / count
    var = jnp.maximum(s2 / count - mean * mean, 0.0)       # biased variance (PyTorch BN)
    inv_std = jax.lax.rsqrt(var + BN_EPS)
    scale = bn_gamma.astype(jnp.float32).reshape(c_out, 1) * inv_std
    shift = bn_beta.astype(jnp.float32).reshape(c_out, 1) - mean * scale
    scale = scale.reshape(1, c_out, 1)
    shift = shift.reshape(1, c_out, 1)

    # ---- Pass 2: normalize + hardswish; output emitted directly in NCHW (flat HW) ----
    tile2 = _pick_col_tile(hw, max(block_m, 2048))
    j_tiles = hw // tile2
    out_flat = pl.pallas_call(
        _bn_hswish_kernel,
        out_shape=jax.ShapeDtypeStruct((n, c_out, hw), jnp.float32),
        grid=(n, j_tiles),
        in_specs=[
            pl.BlockSpec((1, c_out, tile2), lambda i, j: (i, 0, j)),
            pl.BlockSpec((1, c_out, 1), lambda i, j: (0, 0, 0)),
            pl.BlockSpec((1, c_out, 1), lambda i, j: (0, 0, 0)),
        ],
        out_specs=pl.BlockSpec((1, c_out, tile2), lambda i, j: (i, 0, j)),
        compiler_params=pltpu.CompilerParams(
            dimension_semantics=("parallel", "parallel"),
            vmem_limit_bytes=vmem_limit),
    )(y, scale, shift)

    # (N, Cout, Ho*Wo) -> (N, Cout, Ho, Wo): trailing-dim split, no data movement.
    return out_flat.reshape(n, c_out, ho, wo)


def _reference(x_nchw, conv_weight, bn_gamma, bn_beta, *, stride, k):
    """Plain-JAX reference of ConvBNLayer.forward (training-mode BN), with the same
    bf16 operand precision as the kernel's MXU path."""
    pad = (k - 1) // 2
    xq = x_nchw.astype(jnp.bfloat16).astype(jnp.float32)
    wq = conv_weight.astype(jnp.bfloat16).astype(jnp.float32)
    y = jax.lax.conv_general_dilated(
        xq, wq, window_strides=(stride, stride),
        padding=[(pad, pad), (pad, pad)],
        dimension_numbers=("NCHW", "OIHW", "NCHW"))
    mean = y.mean(axis=(0, 2, 3), keepdims=True)
    var = ((y - mean) ** 2).mean(axis=(0, 2, 3), keepdims=True)
    z = (y - mean) * jax.lax.rsqrt(var + BN_EPS)
    z = z * bn_gamma.reshape(1, -1, 1, 1) + bn_beta.reshape(1, -1, 1, 1)
    return z * jnp.clip(z + 3.0, 0.0, 6.0) / 6.0


if __name__ == "__main__":
    # ConvBNLayer(num_channels=4, filter_size=3, num_filters=8, stride=1, num_groups=1)
    N, C_IN, H, W = 2, 4, 16, 16
    C_OUT, K, STRIDE = 8, 3, 1

    key = jax.random.PRNGKey(0)
    k_x, k_w, k_g, k_b = jax.random.split(key, 4)
    x = jax.random.normal(k_x, (N, C_IN, H, W), dtype=jnp.float32)
    conv_weight = jax.random.normal(k_w, (C_OUT, C_IN, K, K), dtype=jnp.float32) * 0.1
    bn_gamma = 1.0 + 0.1 * jax.random.normal(k_g, (C_OUT,), dtype=jnp.float32)
    bn_beta = 0.1 * jax.random.normal(k_b, (C_OUT,), dtype=jnp.float32)

    # block_m=128 -> pass-1 grid (N=2, 2 row tiles): exercises tiling + stat accumulation.
    out = conv_bn_hswish(x, conv_weight, bn_gamma, bn_beta,
                         filter_size=K, stride=STRIDE, num_groups=1, block_m=128)
    out = jax.block_until_ready(out)
    assert out.shape == (N, C_OUT, H, W), out.shape

    ref = jax.block_until_ready(_reference(x, conv_weight, bn_gamma, bn_beta,
                                           stride=STRIDE, k=K))
    max_err = float(jnp.max(jnp.abs(out - ref)))
    assert max_err < 5e-2, f"mismatch vs reference: max abs err = {max_err}"

    print("KERNEL_OK")
</pallas_src>

<mosaic_0001>
module attributes {stable_mosaic.version = 11 : i64} {
  func.func @kernel(%arg0: i32, %arg1: i32, %arg2: memref<1x18x18x4xbf16, #tpu.memory_space<vmem>>, %arg3: memref<9x8x4xbf16, #tpu.memory_space<vmem>>, %arg4: memref<1x8x128xbf16, #tpu.memory_space<vmem>>, %arg5: memref<1x8x1xf32, #tpu.memory_space<vmem>>, %arg6: memref<1x8x1xf32, #tpu.memory_space<vmem>>) attributes {dimension_semantics = [#tpu.dimension_semantics<parallel>, #tpu.dimension_semantics<arbitrary>], iteration_bounds = array<i64: 2, 2>, scalar_prefetch = 0 : i64, scratch_operands = 0 : i64, tpu.core_type = #tpu.core_type<tc>, window_params = [{transform_indices = @transform_0, window_bounds = array<i64: 1, 18, 18, 4>}, {pipeline_mode = #tpu.pipeline_mode<synchronous>, transform_indices = @transform_1, window_bounds = array<i64: 9, 8, 4>}, {transform_indices = @transform_2, window_bounds = array<i64: 1, 8, 128>}, {transform_indices = @transform_3, window_bounds = array<i64: 1, 8, 1>}, {transform_indices = @transform_4, window_bounds = array<i64: 1, 8, 1>}]} {
    %c8_i32 = arith.constant 8 : i32
    %0 = arith.muli %arg1, %c8_i32 : i32
    %cst = arith.constant 0.000000e+00 : f32
    %1 = vector.broadcast %cst : f32 to vector<8x128xf32>
    %c0_i32 = arith.constant 0 : i32
    %2 = arith.addi %0, %c0_i32 : i32
    %c0 = arith.constant 0 : index
    %3 = arith.index_cast %2 : i32 to index
    %c0_0 = arith.constant 0 : index
    %c0_1 = arith.constant 0 : index
    %4 = vector.load %arg2[%c0, %3, %c0_0, %c0_1] : memref<1x18x18x4xbf16, #tpu.memory_space<vmem>>, vector<1x8x16x4xbf16>
    %5 = vector.shape_cast %4 : vector<1x8x16x4xbf16> to vector<8x16x4xbf16>
    %6 = vector.shape_cast %5 : vector<8x16x4xbf16> to vector<128x4xbf16>
    %c0_2 = arith.constant 0 : index
    %c0_3 = arith.constant 0 : index
    %c0_4 = arith.constant 0 : index
    %7 = vector.load %arg3[%c0_2, %c0_3, %c0_4] : memref<9x8x4xbf16, #tpu.memory_space<vmem>>, vector<1x8x4xbf16>
    %8 = vector.shape_cast %7 : vector<1x8x4xbf16> to vector<8x4xbf16>
    %cst_5 = arith.constant dense<0.000000e+00> : vector<8x128xf32>
    %9 = tpu.matmul %8, %6, %cst_5 {dimension_numbers = #tpu.dot_dimension_numbers<[1], [1], [0], [0], [0, 0, 1, 0], [], []>} : vector<8x4xbf16>, vector<128x4xbf16>, vector<8x128xf32> -> vector<8x128xf32>
    %10 = arith.addf %1, %9 : vector<8x128xf32>
    %c0_i32_6 = arith.constant 0 : i32
    %11 = arith.addi %0, %c0_i32_6 : i32
    %c0_7 = arith.constant 0 : index
    %12 = arith.index_cast %11 : i32 to index
    %c1 = arith.constant 1 : index
    %c0_8 = arith.constant 0 : index
    %13 = vector.load %arg2[%c0_7, %12, %c1, %c0_8] : memref<1x18x18x4xbf16, #tpu.memory_space<vmem>>, vector<1x8x16x4xbf16>
    %14 = vector.shape_cast %13 : vector<1x8x16x4xbf16> to vector<8x16x4xbf16>
    %15 = vector.shape_cast %14 : vector<8x16x4xbf16> to vector<128x4xbf16>
    %c1_9 = arith.constant 1 : index
    %c0_10 = arith.constant 0 : index
    %c0_11 = arith.constant 0 : index
    %16 = vector.load %arg3[%c1_9, %c0_10, %c0_11] : memref<9x8x4xbf16, #tpu.memory_space<vmem>>, vector<1x8x4xbf16>
    %17 = vector.shape_cast %16 : vector<1x8x4xbf16> to vector<8x4xbf16>
    %cst_12 = arith.constant dense<0.000000e+00> : vector<8x128xf32>
    %18 = tpu.matmul %17, %15, %cst_12 {dimension_numbers = #tpu.dot_dimension_numbers<[1], [1], [0], [0], [0, 0, 1, 0], [], []>} : vector<8x4xbf16>, vector<128x4xbf16>, vector<8x128xf32> -> vector<8x128xf32>
    %19 = arith.addf %10, %18 : vector<8x128xf32>
    %c0_i32_13 = arith.constant 0 : i32
    %20 = arith.addi %0, %c0_i32_13 : i32
    %c0_14 = arith.constant 0 : index
    %21 = arith.index_cast %20 : i32 to index
    %c2 = arith.constant 2 : index
    %c0_15 = arith.constant 0 : index
    %22 = vector.load %arg2[%c0_14, %21, %c2, %c0_15] : memref<1x18x18x4xbf16, #tpu.memory_space<vmem>>, vector<1x8x16x4xbf16>
    %23 = vector.shape_cast %22 : vector<1x8x16x4xbf16> to vector<8x16x4xbf16>
    %24 = vector.shape_cast %23 : vector<8x16x4xbf16> to vector<128x4xbf16>
    %c2_16 = arith.constant 2 : index
    %c0_17 = arith.constant 0 : index
    %c0_18 = arith.constant 0 : index
    %25 = vector.load %arg3[%c2_16, %c0_17, %c0_18] : memref<9x8x4xbf16, #tpu.memory_space<vmem>>, vector<1x8x4xbf16>
    %26 = vector.shape_cast %25 : vector<1x8x4xbf16> to vector<8x4xbf16>
    %cst_19 = arith.constant dense<0.000000e+00> : vector<8x128xf32>
    %27 = tpu.matmul %26, %24, %cst_19 {dimension_numbers = #tpu.dot_dimension_numbers<[1], [1], [0], [0], [0, 0, 1, 0], [], []>} : vector<8x4xbf16>, vector<128x4xbf16>, vector<8x128xf32> -> vector<8x128xf32>
    %28 = arith.addf %19, %27 : vector<8x128xf32>
    %c1_i32 = arith.constant 1 : i32
    %29 = arith.addi %0, %c1_i32 : i32
    %c0_20 = arith.constant 0 : index
    %30 = arith.index_cast %29 : i32 to index
    %c0_21 = arith.constant 0 : index
    %c0_22 = arith.constant 0 : index
    %31 = vector.load %arg2[%c0_20, %30, %c0_21, %c0_22] : memref<1x18x18x4xbf16, #tpu.memory_space<vmem>>, vector<1x8x16x4xbf16>
    %32 = vector.shape_cast %31 : vector<1x8x16x4xbf16> to vector<8x16x4xbf16>
    %33 = vector.shape_cast %32 : vector<8x16x4xbf16> to vector<128x4xbf16>
    %c3 = arith.constant 3 : index
    %c0_23 = arith.constant 0 : index
    %c0_24 = arith.constant 0 : index
    %34 = vector.load %arg3[%c3, %c0_23, %c0_24] : memref<9x8x4xbf16, #tpu.memory_space<vmem>>, vector<1x8x4xbf16>
    %35 = vector.shape_cast %34 : vector<1x8x4xbf16> to vector<8x4xbf16>
    %cst_25 = arith.constant dense<0.000000e+00> : vector<8x128xf32>
    %36 = tpu.matmul %35, %33, %cst_25 {dimension_numbers = #tpu.dot_dimension_numbers<[1], [1], [0], [0], [0, 0, 1, 0], [], []>} : vector<8x4xbf16>, vector<128x4xbf16>, vector<8x128xf32> -> vector<8x128xf32>
    %37 = arith.addf %28, %36 : vector<8x128xf32>
    %c1_i32_26 = arith.constant 1 : i32
    %38 = arith.addi %0, %c1_i32_26 : i32
    %c0_27 = arith.constant 0 : index
    %39 = arith.index_cast %38 : i32 to index
    %c1_28 = arith.constant 1 : index
    %c0_29 = arith.constant 0 : index
    %40 = vector.load %arg2[%c0_27, %39, %c1_28, %c0_29] : memref<1x18x18x4xbf16, #tpu.memory_space<vmem>>, vector<1x8x16x4xbf16>
    %41 = vector.shape_cast %40 : vector<1x8x16x4xbf16> to vector<8x16x4xbf16>
    %42 = vector.shape_cast %41 : vector<8x16x4xbf16> to vector<128x4xbf16>
    %c4 = arith.constant 4 : index
    %c0_30 = arith.constant 0 : index
    %c0_31 = arith.constant 0 : index
    %43 = vector.load %arg3[%c4, %c0_30, %c0_31] : memref<9x8x4xbf16, #tpu.memory_space<vmem>>, vector<1x8x4xbf16>
    %44 = vector.shape_cast %43 : vector<1x8x4xbf16> to vector<8x4xbf16>
    %cst_32 = arith.constant dense<0.000000e+00> : vector<8x128xf32>
    %45 = tpu.matmul %44, %42, %cst_32 {dimension_numbers = #tpu.dot_dimension_numbers<[1], [1], [0], [0], [0, 0, 1, 0], [], []>} : vector<8x4xbf16>, vector<128x4xbf16>, vector<8x128xf32> -> vector<8x128xf32>
    %46 = arith.addf %37, %45 : vector<8x128xf32>
    %c1_i32_33 = arith.constant 1 : i32
    %47 = arith.addi %0, %c1_i32_33 : i32
    %c0_34 = arith.constant 0 : index
    %48 = arith.index_cast %47 : i32 to index
    %c2_35 = arith.constant 2 : index
    %c0_36 = arith.constant 0 : index
    %49 = vector.load %arg2[%c0_34, %48, %c2_35, %c0_36] : memref<1x18x18x4xbf16, #tpu.memory_space<vmem>>, vector<1x8x16x4xbf16>
    %50 = vector.shape_cast %49 : vector<1x8x16x4xbf16> to vector<8x16x4xbf16>
    %51 = vector.shape_cast %50 : vector<8x16x4xbf16> to vector<128x4xbf16>
    %c5 = arith.constant 5 : index
    %c0_37 = arith.constant 0 : index
    %c0_38 = arith.constant 0 : index
    %52 = vector.load %arg3[%c5, %c0_37, %c0_38] : memref<9x8x4xbf16, #tpu.memory_space<vmem>>, vector<1x8x4xbf16>
    %53 = vector.shape_cast %52 : vector<1x8x4xbf16> to vector<8x4xbf16>
    %cst_39 = arith.constant dense<0.000000e+00> : vector<8x128xf32>
    %54 = tpu.matmul %53, %51, %cst_39 {dimension_numbers = #tpu.dot_dimension_numbers<[1], [1], [0], [0], [0, 0, 1, 0], [], []>} : vector<8x4xbf16>, vector<128x4xbf16>, vector<8x128xf32> -> vector<8x128xf32>
    %55 = arith.addf %46, %54 : vector<8x128xf32>
    %c2_i32 = arith.constant 2 : i32
    %56 = arith.addi %0, %c2_i32 : i32
    %c0_40 = arith.constant 0 : index
    %57 = arith.index_cast %56 : i32 to index
    %c0_41 = arith.constant 0 : index
    %c0_42 = arith.constant 0 : index
    %58 = vector.load %arg2[%c0_40, %57, %c0_41, %c0_42] : memref<1x18x18x4xbf16, #tpu.memory_space<vmem>>, vector<1x8x16x4xbf16>
    %59 = vector.shape_cast %58 : vector<1x8x16x4xbf16> to vector<8x16x4xbf16>
    %60 = vector.shape_cast %59 : vector<8x16x4xbf16> to vector<128x4xbf16>
    %c6 = arith.constant 6 : index
    %c0_43 = arith.constant 0 : index
    %c0_44 = arith.constant 0 : index
    %61 = vector.load %arg3[%c6, %c0_43, %c0_44] : memref<9x8x4xbf16, #tpu.memory_space<vmem>>, vector<1x8x4xbf16>
    %62 = vector.shape_cast %61 : vector<1x8x4xbf16> to vector<8x4xbf16>
    %cst_45 = arith.constant dense<0.000000e+00> : vector<8x128xf32>
    %63 = tpu.matmul %62, %60, %cst_45 {dimension_numbers = #tpu.dot_dimension_numbers<[1], [1], [0], [0], [0, 0, 1, 0], [], []>} : vector<8x4xbf16>, vector<128x4xbf16>, vector<8x128xf32> -> vector<8x128xf32>
    %64 = arith.addf %55, %63 : vector<8x128xf32>
    %c2_i32_46 = arith.constant 2 : i32
    %65 = arith.addi %0, %c2_i32_46 : i32
    %c0_47 = arith.constant 0 : index
    %66 = arith.index_cast %65 : i32 to index
    %c1_48 = arith.constant 1 : index
    %c0_49 = arith.constant 0 : index
    %67 = vector.load %arg2[%c0_47, %66, %c1_48, %c0_49] : memref<1x18x18x4xbf16, #tpu.memory_space<vmem>>, vector<1x8x16x4xbf16>
    %68 = vector.shape_cast %67 : vector<1x8x16x4xbf16> to vector<8x16x4xbf16>
    %69 = vector.shape_cast %68 : vector<8x16x4xbf16> to vector<128x4xbf16>
    %c7 = arith.constant 7 : index
    %c0_50 = arith.constant 0 : index
    %c0_51 = arith.constant 0 : index
    %70 = vector.load %arg3[%c7, %c0_50, %c0_51] : memref<9x8x4xbf16, #tpu.memory_space<vmem>>, vector<1x8x4xbf16>
    %71 = vector.shape_cast %70 : vector<1x8x4xbf16> to vector<8x4xbf16>
    %cst_52 = arith.constant dense<0.000000e+00> : vector<8x128xf32>
    %72 = tpu.matmul %71, %69, %cst_52 {dimension_numbers = #tpu.dot_dimension_numbers<[1], [1], [0], [0], [0, 0, 1, 0], [], []>} : vector<8x4xbf16>, vector<128x4xbf16>, vector<8x128xf32> -> vector<8x128xf32>
    %73 = arith.addf %64, %72 : vector<8x128xf32>
    %c2_i32_53 = arith.constant 2 : i32
    %74 = arith.addi %0, %c2_i32_53 : i32
    %c0_54 = arith.constant 0 : index
    %75 = arith.index_cast %74 : i32 to index
    %c2_55 = arith.constant 2 : index
    %c0_56 = arith.constant 0 : index
    %76 = vector.load %arg2[%c0_54, %75, %c2_55, %c0_56] : memref<1x18x18x4xbf16, #tpu.memory_space<vmem>>, vector<1x8x16x4xbf16>
    %77 = vector.shape_cast %76 : vector<1x8x16x4xbf16> to vector<8x16x4xbf16>
    %78 = vector.shape_cast %77 : vector<8x16x4xbf16> to vector<128x4xbf16>
    %c8 = arith.constant 8 : index
    %c0_57 = arith.constant 0 : index
    %c0_58 = arith.constant 0 : index
    %79 = vector.load %arg3[%c8, %c0_57, %c0_58] : memref<9x8x4xbf16, #tpu.memory_space<vmem>>, vector<1x8x4xbf16>
    %80 = vector.shape_cast %79 : vector<1x8x4xbf16> to vector<8x4xbf16>
    %cst_59 = arith.constant dense<0.000000e+00> : vector<8x128xf32>
    %81 = tpu.matmul %80, %78, %cst_59 {dimension_numbers = #tpu.dot_dimension_numbers<[1], [1], [0], [0], [0, 0, 1, 0], [], []>} : vector<8x4xbf16>, vector<128x4xbf16>, vector<8x128xf32> -> vector<8x128xf32>
    %82 = arith.addf %73, %81 : vector<8x128xf32>
    %83 = arith.truncf %82 : vector<8x128xf32> to vector<8x128xbf16>
    %c0_60 = arith.constant 0 : index
    %c0_61 = arith.constant 0 : index
    %c0_62 = arith.constant 0 : index
    %84 = vector.load %arg4[%c0_60, %c0_61, %c0_62] : memref<1x8x128xbf16, #tpu.memory_space<vmem>>, vector<1x8x128xbf16>
    %85 = vector.shape_cast %84 : vector<1x8x128xbf16> to vector<8x128xbf16>
    %86 = vector.shape_cast %83 : vector<8x128xbf16> to vector<1x8x128xbf16>
    tpu.vector_store %arg4[%c0_60, %c0_61, %c0_62], %86 {strides = array<i32>} : memref<1x8x128xbf16, #tpu.memory_space<vmem>>, vector<1x8x128xbf16>,
    %c0_i32_63 = arith.constant 0 : i32
    %87 = arith.cmpi eq, %arg1, %c0_i32_63 : i32
    %88 = arith.extui %87 : i1 to i32
    %c0_i32_64 = arith.constant 0 : i32
    %89 = arith.cmpi ne, %88, %c0_i32_64 : i32
    scf.if %89 {
      %cst_79 = arith.constant 0.000000e+00 : f32
      %107 = vector.broadcast %cst_79 : f32 to vector<1x8x1xf32>
      %c0_80 = arith.constant 0 : index
      %c0_81 = arith.constant 0 : index
      %c0_82 = arith.constant 0 : index
      %108 = vector.load %arg5[%c0_80, %c0_81, %c0_82] : memref<1x8x1xf32, #tpu.memory_space<vmem>>, vector<1x8x1xf32>
      tpu.vector_store %arg5[%c0_80, %c0_81, %c0_82], %107 {strides = array<i32>} : memref<1x8x1xf32, #tpu.memory_space<vmem>>, vector<1x8x1xf32>,
      %cst_83 = arith.constant 0.000000e+00 : f32
      %109 = vector.broadcast %cst_83 : f32 to vector<1x8x1xf32>
      %c0_84 = arith.constant 0 : index
      %c0_85 = arith.constant 0 : index
      %c0_86 = arith.constant 0 : index
      %110 = vector.load %arg6[%c0_84, %c0_85, %c0_86] : memref<1x8x1xf32, #tpu.memory_space<vmem>>, vector<1x8x1xf32>
      tpu.vector_store %arg6[%c0_84, %c0_85, %c0_86], %109 {strides = array<i32>} : memref<1x8x1xf32, #tpu.memory_space<vmem>>, vector<1x8x1xf32>,
    } else {
    }
    %c0_65 = arith.constant 0 : index
    %c0_66 = arith.constant 0 : index
    %c0_67 = arith.constant 0 : index
    %90 = vector.load %arg5[%c0_65, %c0_66, %c0_67] : memref<1x8x1xf32, #tpu.memory_space<vmem>>, vector<1x8x1xf32>
    %91 = vector.shape_cast %90 : vector<1x8x1xf32> to vector<8x1xf32>
    %cst_68 = arith.constant dense<0.000000e+00> : vector<8xf32>
    %92 = vector.multi_reduction <add>, %82, %cst_68 [1] : vector<8x128xf32> to vector<8xf32>
    %93 = vector.shape_cast %92 : vector<8xf32> to vector<8x1xf32>
    %94 = arith.addf %91, %93 : vector<8x1xf32>
    %c0_69 = arith.constant 0 : index
    %c0_70 = arith.constant 0 : index
    %c0_71 = arith.constant 0 : index
    %95 = vector.load %arg5[%c0_69, %c0_70, %c0_71] : memref<1x8x1xf32, #tpu.memory_space<vmem>>, vector<1x8x1xf32>
    %96 = vector.shape_cast %95 : vector<1x8x1xf32> to vector<8x1xf32>
    %97 = vector.shape_cast %94 : vector<8x1xf32> to vector<1x8x1xf32>
    tpu.vector_store %arg5[%c0_69, %c0_70, %c0_71], %97 {strides = array<i32>} : memref<1x8x1xf32, #tpu.memory_space<vmem>>, vector<1x8x1xf32>,
    %c0_72 = arith.constant 0 : index
    %c0_73 = arith.constant 0 : index
    %c0_74 = arith.constant 0 : index
    %98 = vector.load %arg6[%c0_72, %c0_73, %c0_74] : memref<1x8x1xf32, #tpu.memory_space<vmem>>, vector<1x8x1xf32>
    %99 = vector.shape_cast %98 : vector<1x8x1xf32> to vector<8x1xf32>
    %100 = arith.mulf %82, %82 : vector<8x128xf32>
    %cst_75 = arith.constant dense<0.000000e+00> : vector<8xf32>
    %101 = vector.multi_reduction <add>, %100, %cst_75 [1] : vector<8x128xf32> to vector<8xf32>
    %102 = vector.shape_cast %101 : vector<8xf32> to vector<8x1xf32>
    %103 = arith.addf %99, %102 : vector<8x1xf32>
    %c0_76 = arith.constant 0 : index
    %c0_77 = arith.constant 0 : index
    %c0_78 = arith.constant 0 : index
    %104 = vector.load %arg6[%c0_76, %c0_77, %c0_78] : memref<1x8x1xf32, #tpu.memory_space<vmem>>, vector<1x8x1xf32>
    %105 = vector.shape_cast %104 : vector<1x8x1xf32> to vector<8x1xf32>
    %106 = vector.shape_cast %103 : vector<8x1xf32> to vector<1x8x1xf32>
    tpu.vector_store %arg6[%c0_76, %c0_77, %c0_78], %106 {strides = array<i32>} : memref<1x8x1xf32, #tpu.memory_space<vmem>>, vector<1x8x1xf32>,
    return
  }
  func.func @transform_0(%arg0: i32, %arg1: i32) -> (i32, i32, i32, i32) {
    %c0_i32 = arith.constant 0 : i32
    %c0_i32_0 = arith.constant 0 : i32
    %c0_i32_1 = arith.constant 0 : i32
    %c0_i32_2 = arith.constant 0 : i32
    return %arg0, %c0_i32, %c0_i32_0, %c0_i32_1 : i32, i32, i32, i32
  }
  func.func @transform_1(%arg0: i32, %arg1: i32) -> (i32, i32, i32) {
    %c0_i32 = arith.constant 0 : i32
    %c0_i32_0 = arith.constant 0 : i32
    %c0_i32_1 = arith.constant 0 : i32
    %c0_i32_2 = arith.constant 0 : i32
    return %c0_i32, %c0_i32_0, %c0_i32_1 : i32, i32, i32
  }
  func.func @transform_2(%arg0: i32, %arg1: i32) -> (i32, i32, i32) {
    %c0_i32 = arith.constant 0 : i32
    %c0_i32_0 = arith.constant 0 : i32
    return %arg0, %c0_i32, %arg1 : i32, i32, i32
  }
  func.func @transform_3(%arg0: i32, %arg1: i32) -> (i32, i32, i32) {
    %c0_i32 = arith.constant 0 : i32
    %c0_i32_0 = arith.constant 0 : i32
    %c0_i32_1 = arith.constant 0 : i32
    return %arg0, %c0_i32, %c0_i32_0 : i32, i32, i32
  }
  func.func @transform_4(%arg0: i32, %arg1: i32) -> (i32, i32, i32) {
    %c0_i32 = arith.constant 0 : i32
    %c0_i32_0 = arith.constant 0 : i32
    %c0_i32_1 = arith.constant 0 : i32
    return %arg0, %c0_i32, %c0_i32_0 : i32, i32, i32
  }
}

module attributes {stable_mosaic.version = 11 : i64} {
  func.func @_bn_hswish_kernel(%arg0: i32, %arg1: i32, %arg2: memref<1x8x256xbf16, #tpu.memory_space<vmem>>, %arg3: memref<1x8x1xf32, #tpu.memory_space<vmem>>, %arg4: memref<1x8x1xf32, #tpu.memory_space<vmem>>, %arg5: memref<1x8x256xf32, #tpu.memory_space<vmem>>) attributes {dimension_semantics = [#tpu.dimension_semantics<parallel>, #tpu.dimension_semantics<parallel>], iteration_bounds = array<i64: 2, 1>, scalar_prefetch = 0 : i64, scratch_operands = 0 : i64, tpu.core_type = #tpu.core_type<tc>, window_params = [{transform_indices = @transform_0, window_bounds = array<i64: 1, 8, 256>}, {pipeline_mode = #tpu.pipeline_mode<synchronous>, transform_indices = @transform_1, window_bounds = array<i64: 1, 8, 1>}, {pipeline_mode = #tpu.pipeline_mode<synchronous>, transform_indices = @transform_2, window_bounds = array<i64: 1, 8, 1>}, {transform_indices = @transform_3, window_bounds = array<i64: 1, 8, 256>}]} {
    %c0 = arith.constant 0 : index
    %c0_0 = arith.constant 0 : index
    %c0_1 = arith.constant 0 : index
    %0 = vector.load %arg2[%c0, %c0_0, %c0_1] : memref<1x8x256xbf16, #tpu.memory_space<vmem>>, vector<1x8x256xbf16>
    %1 = arith.extf %0 : vector<1x8x256xbf16> to vector<1x8x256xf32>
    %c0_2 = arith.constant 0 : index
    %c0_3 = arith.constant 0 : index
    %c0_4 = arith.constant 0 : index
    %2 = vector.load %arg3[%c0_2, %c0_3, %c0_4] : memref<1x8x1xf32, #tpu.memory_space<vmem>>, vector<1x8x1xf32>
    %3 = vector.broadcast %2 : vector<1x8x1xf32> to vector<1x8x256xf32>
    %4 = arith.mulf %1, %3 : vector<1x8x256xf32>
    %c0_5 = arith.constant 0 : index
    %c0_6 = arith.constant 0 : index
    %c0_7 = arith.constant 0 : index
    %5 = vector.load %arg4[%c0_5, %c0_6, %c0_7] : memref<1x8x1xf32, #tpu.memory_space<vmem>>, vector<1x8x1xf32>
    %6 = vector.broadcast %5 : vector<1x8x1xf32> to vector<1x8x256xf32>
    %7 = arith.addf %4, %6 : vector<1x8x256xf32>
    %cst = arith.constant 3.000000e+00 : f32
    %8 = vector.broadcast %cst : f32 to vector<1x8x256xf32>
    %9 = arith.addf %7, %8 : vector<1x8x256xf32>
    %cst_8 = arith.constant 0.000000e+00 : f32
    %cst_9 = arith.constant 6.000000e+00 : f32
    %10 = vector.broadcast %cst_8 : f32 to vector<1x8x256xf32>
    %11 = arith.maximumf %10, %9 : vector<1x8x256xf32>
    %12 = vector.broadcast %cst_9 : f32 to vector<1x8x256xf32>
    %13 = arith.minimumf %12, %11 : vector<1x8x256xf32>
    %14 = arith.mulf %7, %13 : vector<1x8x256xf32>
    %cst_10 = arith.constant 0.166666672 : f32
    %15 = vector.broadcast %cst_10 : f32 to vector<1x8x256xf32>
    %16 = arith.mulf %14, %15 : vector<1x8x256xf32>
    %c0_11 = arith.constant 0 : index
    %c0_12 = arith.constant 0 : index
    %c0_13 = arith.constant 0 : index
    %17 = vector.load %arg5[%c0_11, %c0_12, %c0_13] : memref<1x8x256xf32, #tpu.memory_space<vmem>>, vector<1x8x256xf32>
    tpu.vector_store %arg5[%c0_11, %c0_12, %c0_13], %16 {strides = array<i32>} : memref<1x8x256xf32, #tpu.memory_space<vmem>>, vector<1x8x256xf32>,
    return
  }
  func.func @transform_0(%arg0: i32, %arg1: i32) -> (i32, i32, i32) {
    %c0_i32 = arith.constant 0 : i32
    %c0_i32_0 = arith.constant 0 : i32
    return %arg0, %c0_i32, %arg1 : i32, i32, i32
  }
  func.func @transform_1(%arg0: i32, %arg1: i32) -> (i32, i32, i32) {
    %c0_i32 = arith.constant 0 : i32
    %c0_i32_0 = arith.constant 0 : i32
    %c0_i32_1 = arith.constant 0 : i32
    %c0_i32_2 = arith.constant 0 : i32
    return %c0_i32, %c0_i32_0, %c0_i32_1 : i32, i32, i32
  }
  func.func @transform_2(%arg0: i32, %arg1: i32) -> (i32, i32, i32) {
    %c0_i32 = arith.constant 0 : i32
    %c0_i32_0 = arith.constant 0 : i32
    %c0_i32_1 = arith.constant 0 : i32
    %c0_i32_2 = arith.constant 0 : i32
    return %c0_i32, %c0_i32_0, %c0_i32_1 : i32, i32, i32
  }
  func.func @transform_3(%arg0: i32, %arg1: i32) -> (i32, i32, i32) {
    %c0_i32 = arith.constant 0 : i32
    %c0_i32_0 = arith.constant 0 : i32
    return %arg0, %c0_i32, %arg1 : i32, i32, i32
  }
}

</mosaic_0001>

<bundles_post_ra>
// kernel: conv_bn_hswish.3
= control target key start
LH: loop header
LB: loop body
LE: loop exit
PB: predicated region body
PF: predicated region fallthrough
CT: control target
= control target key end

     0   :  { %s412_s12 = smov 0   ;;  %s414_s13 = smov 0   ;;  %s451_s0 = inlined_call_operand.vmem [shape: bf16[2,8,256], index: 0, kind: input, shape index: {}]   ;;  %s452_s1 = inlined_call_operand.vmem [shape: f32[1,8,1], index: 1, kind: input, shape index: {}]   ;;  %s453_s2 = inlined_call_operand.vmem [shape: f32[1,8,1], index: 2, kind: input, shape index: {}]   ;;  %s454_s3 = inlined_call_operand.vmem [shape: f32[2,8,256], index: 3, kind: output, shape index: {}]  }
   0x1   :  { %s416_s14 = smov 0  }
   0x2 LB: > { %s25_s15 = sadd.s32 1, %s385_s13  ;;  %p332_p0 = scmp.ge.s32.totalorder %s389_s14, 1  ;;  %s389_s14 = sphi %s416_s14, %s13_s14   ;;  %s385_s13 = sphi %s414_s13, %s456_s13   ;;  %s381_s12 = sphi %s412_s12, %s455_s12  }
   0x3   : > { %p27_p1 = scmp.ge.s32.totalorder %s25_s15, 2  ;;  %p158_p2 = scmp.lt.s32.totalorder %s389_s14, 3 }
   0x5   : > { %s458_s15 = smov (%p27_p1, %s25_s15), 0  ;;  %p159_p3 = pnand %p332_p0, %p158_p2 }
   0x6   : > { %p191_p4 = scmp.lt.s32.totalorder (!%p159_p3), %s381_s12, 1 }
   0x7   : > { %162 = sbr.rel (%p159_p3) target bundleno = 155 (0x9b), region = 32 }
   0xc   : > { %v213_v0 = vld [vmem:[%s452_s1] sm:$0xff]  ;;  %v391_v1 = vmov 0   ;;  %s460_s12 = smov (!%p191_p4, %s381_s12), 1 }
   0xd   : > { %366 = vset.pattern.permute.xlu0 %v391_v1  ;;  %v221_v2 = vld [vmem:[%s453_s2] sm:$0xff]  ;;  %s339_s20 = sshll.u32 %s460_s12, 3  ;;  %s340_s24 = sshll.u32 %s460_s12, 4 }
   0xe   : > { %216 = vperm.xlu0 %366, %v213_v0   ;;  %s198_s23 = scalar_lea.vmem %s451_s0, %s339_s20  ;;  %s208_s27 = scalar_lea.vmem %s454_s3, %s340_s24 }
   0xf   : > { %v210_v3 = vld [vmem:[%s198_s23] sm:$0xff] }
  0x10   : > { %v211_v4 = vunpack.c.l.bf16 %v210_v3  ;;  %v212_v5 = vunpack.c.h.bf16 %v210_v3 }
  0x12   : > { %224 = vperm.xlu0 %366, %v221_v2  }
  0x89   : > { %v217_v6 = vpop.permute.xlu0 %216 }
  0x8a   : > { %v219_v7 = vmul.f32 %v217_v6, %v211_v4  ;;  %v220_v8 = vmul.f32 %v217_v6, %v212_v5 }
  0x8d   : > { %v225_v9 = vpop.permute.xlu0 %224 }
  0x8e   : > { %v227_v10 = vadd.f32 %v225_v9, %v219_v7  ;;  %v228_v11 = vadd.f32 %v225_v9, %v220_v8 }
  0x90   : > { %v229_v12 = vadd.f32 3.0, %v227_v10  ;;  %v230_v13 = vadd.f32 3.0, %v228_v11 }
  0x92   : > { %v231_v14 = vmax.f32 %v229_v12, 0.0  ;;  %v232_v15 = vmax.f32 %v230_v13, 0.0 }
  0x94   : > { %v233_v16 = vmin.f32 %v231_v14, 6.0  ;;  %v234_v17 = vmin.f32 %v232_v15, 6.0 }
  0x96   : > { %v235_v18 = vmul.f32 %v233_v16, %v227_v10  ;;  %v236_v19 = vmul.f32 %v234_v17, %v228_v11 }
  0x98   : > { %v237_v20 = vmul.f32 0.16666667, %v235_v18  ;;  %v238_v21 = vmul.f32 0.16666667, %v236_v19 }
  0x9a   : > { %239 = vst [vmem:[%s208_s27] sm:$0xff] %v237_v20  ;;  %240 = vst [vmem:[%s208_s27 + $0x8] sm:$0xff] %v238_v21 }
  0x9b PF: > { %s13_s14 = sadd.s32 1, %s389_s14   ;;  %s455_s12 = smov %s385_s13 }
  0x9c   : > { %p10_p5 = scmp.ge.s32.totalorder %s13_s14, 4   ;;  %s456_s13 = smov %s458_s15 }
  0x9e   :  { %12 = sbr.rel (!%p10_p5) target bundleno = 2 (0x2), region = 62 }

// kernel: conv_bn_hswish.2
= control target key start
LH: loop header
LB: loop body
LE: loop exit
PB: predicated region body
PF: predicated region fallthrough
CT: control target
= control target key end

     0   :  { %s2886_s15 = smov 0   ;;  %s2888_s16 = smov 0   ;;  %s3931_s0 = inlined_call_operand.vmem [shape: bf16[2,18,18,4], index: 0, kind: input, shape index: {}]   ;;  %s3932_s1 = inlined_call_operand.vmem [shape: bf16[9,8,4], index: 1, kind: input, shape index: {}]   ;;  %s3933_s2 = inlined_call_operand.vmem [shape: bf16[2,8,256], index: 2, kind: output, shape index: {0}]   ;;  %s3934_s3 = inlined_call_operand.vmem [shape: f32[2,8,1], index: 3, kind: output, shape index: {1}]   ;;  %s3935_s4 = inlined_call_operand.vmem [shape: f32[2,8,1], index: 4, kind: output, shape index: {2}]  }
   0x1   :  { %s2890_s17 = smov 0   ;;  %s2892_s18 = smov 0  }
   0x2   :  { %s2894_s19 = smov 0  }
   0x3 LB: > { %s24_s20 = sadd.s32 1, %s2848_s17  ;;  %s27_s21 = sadd.s32 1, %s2852_s18  ;;  %s2856_s19 = sphi %s2894_s19, %s15_s19   ;;  %s2852_s18 = sphi %s2892_s18, %s3943_s18   ;;  %s2848_s17 = sphi %s2890_s17, %s3942_s17   ;;  %s2844_s16 = sphi %s2888_s16, %s3941_s16   ;;  %s2840_s15 = sphi %s2886_s15, %s3940_s15  }
   0x4   : > { %p25_p0 = scmp.ge.s32.totalorder %s24_s20, 2  ;;  %p2263_p1 = scmp.ge.s32.totalorder %s2856_s19, 1 }
   0x5   : > { %p181_p2 = scmp.lt.s32.totalorder %s2856_s19, 5 }
   0x6   : > { %s3945_s20 = smov (%p25_p0, %s24_s20), 0  ;;  %s3947_s21 = smov (!%p25_p0, %s27_s21), %s2852_s18 }
   0x7   : > { %p182_p3 = pnand %p2263_p1, %p181_p2  ;;  %p29_p4 = scmp.ge.s32.totalorder %s3947_s21, 2 }
   0x8   : > { %p218_p5 = scmp.lt.s32.totalorder (!%p182_p3), %s2844_s16, 1  ;;  %s2488_s22 = smul.u32 (!%p182_p3), 96, %s2840_s15 }
   0x9   : > { %s3949_s21 = smov (%p29_p4, %s3947_s21), 0  ;;  %185 = sbr.rel (%p182_p3) target bundleno = 697 (0x2b9), region = 28 }
   0xa   : > { %p225_p6 = scmp.lt.s32.totalorder (!%p182_p3), %s2840_s15, 1  ;;  %p2485_p7 = scmp.ne.s32.totalorder (!%p182_p3), %s2840_s15, 0 }
   0xe   : > { %v2858_v0 = vmov 0.0   ;;  %s3951_s16 = smov (!%p218_p5, %s2844_s16), 1  ;;  %vm2859_vm0 = vmmov 0   ;;  %vm269_vm1 = vsmask.f32 3328  ;;  %vm490_vm2 = vcmask 31744  }
   0xf   : > { %2570 = vmatprep.subr.bf16.mxu0 %v2858_v0  ;;  %2590 = vmatprep.subr.bf16.mxu1 %v2858_v0  ;;  %s2750_s23 = smul.u32 216, %s3951_s16  ;;  %s2267_s24 = sshll.u32 %s3951_s16, 3  ;;  %vm270_vm3 = vsmask.f32 7440  ;;  %vm689_vm5 = vcmask 1042432   ;;  %vm690_vm6 = vcmask 1046532  }
  0x10   : > { %2586 = vmatprep.mubr.msk.bf16.mxu0 %vm2859_vm0, %v2858_v0  ;;  %2606 = vmatprep.mubr.msk.bf16.mxu1 %vm2859_vm0, %v2858_v0  ;;  %s2932_s27 = scalar_lea.vmem %s3934_s3, %s2267_s24  ;;  %s2937_s30 = scalar_lea.vmem %s3935_s4, %s2267_s24  ;;  %vm2968_vm4 = vmor %vm269_vm1, %vm270_vm3  ;;  %v2449_v26 = vld [vmem:[%s3932_s1 + $0x1c] sm:$0xf] }
  0x11   : > { %s222_s7 = scalar_lea.vmem %s3931_s0, %s2750_s23  ;;  %vm3101_vm7 = vmor %vm689_vm5, %vm690_vm6  ;;  %s2265_s11 = sshll.u32 %s3951_s16, 1 }
  0x12   : > { %s2942_s8 = scalar_lea.vmem %s222_s7, %s2488_s22 }
  0x13   : > { %v258_v1 = vld [vmem:[%s2942_s8 + $0x54] sm:$0xf]  ;;  %v2946_v2 = vld [vmem:[%s2942_s8 + $0x58] sm:$0xf]  ;;  %v2949_v3 = vld [vmem:[%s2942_s8 + $0x5c] sm:$0x1] }
  0x14   : > { %v441_v4 = vshrl.u32 %v258_v1, 16  ;;  %v444_v5 = vshll.u32 %v258_v1, 16  ;;  %v450_v6 = vshll.u32 %v2946_v2, 16  ;;  %v454_v7 = vshrl.u32 %v2946_v2, 16  ;;  %v256_v8 = vld [vmem:[%s2942_s8 + $0x48] sm:$0xf] }
  0x15   : > { %v460_v9 = vshll.u32 %v2949_v3, 16  ;;  %v2289_v10 = vcombine.low %v258_v1, %v2946_v2  ;;  %v2957_v11 = vld [vmem:[%s2942_s8 + $0x4c] sm:$0xf]  ;;  %v2960_v16 = vld [vmem:[%s2942_s8 + $0x50] sm:$0x1]  ;;  %v417_v19 = vshrl.u32 %v256_v8, 16 }
  0x16   : > { %v443_v12 = vrot.slane %v441_v4, 4  ;;  %v446_v13 = vrot.slane %v444_v5, 5  ;;  %v452_v14 = vrot.slane %v450_v6, 5  ;;  %v456_v15 = vrot.slane %v454_v7, 4  ;;  %v254_v25 = vld [vmem:[%s2942_s8 + $0x3c] sm:$0xf] }
  0x17   : > { %v462_v17 = vrot.slane %v460_v9, 5  ;;  %v623_v18 = vsel %vm490_vm2, %v2289_v10, 0  ;;  %v420_v20 = vshll.u32 %v256_v8, 16  ;;  %v426_v23 = vshll.u32 %v2957_v11, 16  ;;  %v2976_v35 = vld [vmem:[%s2942_s8 + $0x40] sm:$0xf] }
  0x18   : > { %v447_v21 = vor.u32 %v446_v13, %v443_v12  ;;  %v457_v22 = vor.u32 %v456_v15, %v452_v14  ;;  %2591 = vmatpush3.bf16.xpose.msra.mxu1 %v623_v18  ;;  %v430_v24 = vshrl.u32 %v2957_v11, 16  ;;  %v419_v27 = vrot.slane %v417_v19, 4  ;;  %v2980_v39 = vld [vmem:[%s2942_s8 + $0x44] sm:$0x1]  ;;  %v252_v53 = vld [vmem:[%s2942_s8 + $0x30] sm:$0xf] }
  0x19   : > { %v422_v28 = vrot.slane %v420_v20, 5  ;;  %v436_v29 = vshll.u32 %v2960_v16, 16  ;;  %2592 = vmatprep.subr.bf16.mxu1 %v2858_v0  ;;  %v2288_v30 = vcombine.low %v256_v8, %v2957_v11  ;;  %v428_v33 = vrot.slane %v426_v23, 5  ;;  %v2994_v57 = vld [vmem:[%s2942_s8 + $0x34] sm:$0xf]  ;;  %s226_s10 = scalar_select %p225_p6, %s2840_s15, 1 }
  0x1a   : > { %v448_v31 = vrot.slane %v447_v21, 4  ;;  %v458_v32 = vrot.slane %v457_v22, 4  ;;  %v432_v34 = vrot.slane %v430_v24, 4  ;;  %v393_v40 = vshrl.u32 %v254_v25, 16  ;;  %v3000_v62 = vld [vmem:[%s2942_s8 + $0x38] sm:$0x1] }
  0x1b   : > { %v423_v36 = vor.u32 %v422_v28, %v419_v27  ;;  %v438_v37 = vrot.slane %v436_v29, 5  ;;  %v620_v38 = vsel %vm490_vm2, %v2288_v30, 0  ;;  %v396_v44 = vshll.u32 %v254_v25, 16  ;;  %v3007_v10 = vld [vmem:[%s2942_s8 + $0x24] sm:$0xf]  ;;  %s228_s12 = sadd.s32 %s2265_s11, %s226_s10 }
  0x1c   : > { %v453_v41 = vsel %vm2968_vm4, %v448_v31, %v452_v14  ;;  %v463_v42 = vsel %vm2968_vm4, %v458_v32, %v462_v17  ;;  %v433_v43 = vor.u32 %v432_v34, %v428_v33  ;;  %v395_v47 = vrot.slane %v393_v40, 4  ;;  %v3011_v15 = vld [vmem:[%s2942_s8 + $0x28] sm:$0xf]  ;;  %v3021_v28 = vld [vmem:[%s2942_s8 + $0x2c] sm:$0x1]  ;;  %s2266_s13 = sshll.u32 %s228_s12, 2 }
  0x1d   : > { %v2280_v45 = vcombine.low %v453_v41, %v463_v42  ;;  %v424_v46 = vrot.slane %v423_v36, 4  ;;  %v402_v48 = vshll.u32 %v2976_v35, 16  ;;  %v398_v50 = vrot.slane %v396_v44, 5  ;;  %v3027_v34 = vld [vmem:[%s2942_s8 + $0x18] sm:$0xf]  ;;  %s230_s23 = scalar_lea.vmem %s3933_s2, %s2266_s13 }
  0x1e   : > { %v434_v49 = vrot.slane %v433_v43, 4  ;;  %v406_v51 = vshrl.u32 %v2976_v35, 16  ;;  %v412_v52 = vshll.u32 %v2980_v39, 16  ;;  %v2287_v61 = vcombine.low %v254_v25, %v2976_v35  ;;  %v3031_v41 = vld [vmem:[%s2942_s8 + $0x1c] sm:$0xf] }
  0x1f   : > { %v516_v54 = vsel %vm490_vm2, %v2280_v45, 0  ;;  %v429_v55 = vsel %vm2968_vm4, %v424_v46, %v428_v33  ;;  %v404_v56 = vrot.slane %v402_v48, 5  ;;  %v399_v59 = vor.u32 %v398_v50, %v395_v47 }
  0x20   : > { %2571 = vmatpush3.bf16.xpose.msra.mxu0 %v516_v54  ;;  %v439_v58 = vsel %vm2968_vm4, %v434_v49, %v438_v37  ;;  %2593 = vmatpush3.bf16.xpose.msra.mxu1 %v620_v38  ;;  %v408_v60 = vrot.slane %v406_v51, 4  ;;  %v414_v1 = vrot.slane %v412_v52, 5  ;;  %v369_v4 = vshrl.u32 %v252_v53, 16  ;;  %v3042_v54 = vld [vmem:[%s2942_s8 + $0xc] sm:$0xf] }
  0x21   : > { %2572 = vmatprep.subr.bf16.mxu0 %v2858_v0  ;;  %v2279_v63 = vcombine.low %v429_v55, %v439_v58  ;;  %2594 = vmatprep.subr.bf16.mxu1 %v2858_v0  ;;  %v372_v5 = vshll.u32 %v252_v53, 16  ;;  %v400_v6 = vrot.slane %v399_v59, 4  ;;  %v378_v8 = vshll.u32 %v2994_v57, 16  ;;  %v3049_v58 = vld [vmem:[%s2942_s8 + $0x20] sm:$0x1] }
  0x22   : > { %v409_v7 = vor.u32 %v408_v60, %v404_v56  ;;  %v382_v9 = vshrl.u32 %v2994_v57, 16  ;;  %v371_v12 = vrot.slane %v369_v4, 4  ;;  %v388_v14 = vshll.u32 %v3000_v62, 16 }
  0x23   : > { %v374_v13 = vrot.slane %v372_v5, 5  ;;  %v617_v18 = vsel %vm490_vm2, %v2287_v61, 0  ;;  %v380_v19 = vrot.slane %v378_v8, 5  ;;  %v513_v21 = vsel %vm490_vm2, %v2279_v63, 0 }
  0x24   : > { %v410_v17 = vrot.slane %v409_v7, 4  ;;  %v384_v20 = vrot.slane %v382_v9, 4  ;;  %v405_v22 = vsel %vm2968_vm4, %v400_v6, %v404_v56  ;;  %v345_v24 = vshrl.u32 %v3007_v10, 16  ;;  %v3055_v9 = vld [vmem:[%s2942_s8 + $0x10] sm:$0xf] }
  0x25   : > { %v375_v23 = vor.u32 %v374_v13, %v371_v12  ;;  %v348_v29 = vshll.u32 %v3007_v10, 16  ;;  %v354_v30 = vshll.u32 %v3011_v15, 16  ;;  %v390_v31 = vrot.slane %v388_v14, 5 }
  0x26   : > { %v415_v25 = vsel %vm2968_vm4, %v410_v17, %v414_v1  ;;  %v385_v27 = vor.u32 %v384_v20, %v380_v19  ;;  %v2286_v32 = vcombine.low %v252_v53, %v2994_v57  ;;  %v347_v33 = vrot.slane %v345_v24, 4  ;;  %v3067_v20 = vld [vmem:[%s2942_s8 + $0x14] sm:$0x1] }
  0x27   : > { %v2278_v36 = vcombine.low %v405_v22, %v415_v25  ;;  %v350_v37 = vrot.slane %v348_v29, 5  ;;  %v356_v38 = vrot.slane %v354_v30, 5  ;;  %v358_v40 = vshrl.u32 %v3011_v15, 16 }
  0x28   : > { %2573 = vmatpush3.bf16.xpose.msra.mxu0 %v513_v21  ;;  %2595 = vmatpush3.bf16.xpose.msra.mxu1 %v617_v18  ;;  %v376_v42 = vrot.slane %v375_v23, 4  ;;  %v386_v43 = vrot.slane %v385_v27, 4  ;;  %v364_v46 = vshll.u32 %v3021_v28, 16  ;;  %v321_v47 = vshrl.u32 %v3027_v34, 16 }
  0x29   : > { %2574 = vmatprep.subr.bf16.mxu0 %v2858_v0  ;;  %2596 = vmatprep.subr.bf16.mxu1 %v2858_v0  ;;  %v351_v44 = vor.u32 %v350_v37, %v347_v33  ;;  %v360_v45 = vrot.slane %v358_v40, 4  ;;  %v614_v48 = vsel %vm490_vm2, %v2286_v32, 0  ;;  %v324_v49 = vshll.u32 %v3027_v34, 16  ;;  %v3076_v32 = vld [vmem:[%s2942_s8] sm:$0xf] }
  0x2a   : > { %v510_v50 = vsel %vm490_vm2, %v2278_v36, 0  ;;  %v323_v52 = vrot.slane %v321_v47, 4  ;;  %v330_v53 = vshll.u32 %v3031_v41, 16  ;;  %v381_v55 = vsel %vm2968_vm4, %v376_v42, %v380_v19  ;;  %v672_v40 = vld [vmem:[%s2942_s8 + $0x54] sm:$0xe] }
  0x2b   : > { %v361_v51 = vor.u32 %v360_v45, %v356_v38  ;;  %v391_v56 = vsel %vm2968_vm4, %v386_v43, %v390_v31  ;;  %v326_v59 = vrot.slane %v324_v49, 5  ;;  %v334_v60 = vshrl.u32 %v3031_v41, 16 }
  0x2c   : > { %v352_v61 = vrot.slane %v351_v44, 4  ;;  %v366_v1 = vrot.slane %v364_v46, 5  ;;  %v332_v4 = vrot.slane %v330_v53, 5  ;;  %v297_v6 = vshrl.u32 %v3042_v54, 16 }
  0x2d   : > { %v362_v63 = vrot.slane %v361_v51, 4  ;;  %v336_v5 = vrot.slane %v334_v60, 4  ;;  %v327_v7 = vor.u32 %v326_v59, %v323_v52  ;;  %v340_v8 = vshll.u32 %v3049_v58, 16 }
  0x2e   : > { %v300_v12 = vshll.u32 %v3042_v54, 16  ;;  %v2277_v13 = vcombine.low %v381_v55, %v391_v56  ;;  %v2285_v14 = vcombine.low %v3007_v10, %v3011_v15  ;;  %v357_v18 = vsel %vm2968_vm4, %v352_v61, %v356_v38  ;;  %v3082_v38 = vld [vmem:[%s2942_s8 + $0x4] sm:$0xf] }
  0x2f   : > { %v337_v17 = vor.u32 %v336_v5, %v332_v4  ;;  %v367_v19 = vsel %vm2968_vm4, %v362_v63, %v366_v1  ;;  %v299_v21 = vrot.slane %v297_v6, 4  ;;  %v306_v23 = vshll.u32 %v3055_v9, 16  ;;  %v670_v1 = vld [vmem:[%s2942_s8 + $0x3c] sm:$0xe] }
  0x30   : > { %2575 = vmatpush3.bf16.xpose.msra.mxu0 %v510_v50  ;;  %2597 = vmatpush3.bf16.xpose.msra.mxu1 %v614_v48  ;;  %v302_v22 = vrot.slane %v300_v12, 5  ;;  %v310_v24 = vshrl.u32 %v3055_v9, 16  ;;  %v328_v25 = vrot.slane %v327_v7, 4  ;;  %v342_v10 = vrot.slane %v340_v8, 5  ;;  %v671_v48 = vld [vmem:[%s2942_s8 + $0x48] sm:$0xe] }
  0x31   : > { %2576 = vmatprep.subr.bf16.mxu0 %v2858_v0  ;;  %2598 = vmatprep.subr.bf16.mxu1 %v2858_v0  ;;  %v338_v27 = vrot.slane %v337_v17, 4  ;;  %v2284_v29 = vcombine.low %v3027_v34, %v3031_v41  ;;  %v507_v30 = vsel %vm490_vm2, %v2277_v13, 0  ;;  %v611_v31 = vsel %vm490_vm2, %v2285_v14, 0  ;;  %v669_v17 = vld [vmem:[%s2942_s8 + $0x30] sm:$0xe] }
  0x32   : > { %v2276_v33 = vcombine.low %v357_v18, %v367_v19  ;;  %v316_v36 = vshll.u32 %v3067_v20, 16  ;;  %v2283_v37 = vcombine.low %v3042_v54, %v3055_v9  ;;  %v303_v42 = vor.u32 %v302_v22, %v299_v21 }
  0x33   : > { %v3085_v34 = vrot.slane %v306_v23, 5  ;;  %v312_v43 = vrot.slane %v310_v24, 4  ;;  %v746_v44 = vrot.slane %v2949_v3, 5  ;;  %v333_v45 = vsel %vm2968_vm4, %v328_v25, %v332_v4  ;;  %v3117_v4 = vld [vmem:[%s2942_s8 + $0x8] sm:$0x1] }
  0x34   : > { %v343_v46 = vsel %vm2968_vm4, %v338_v27, %v342_v10  ;;  %v608_v47 = vsel %vm490_vm2, %v2284_v29, 0  ;;  %v273_v49 = vshrl.u32 %v3076_v32, 16  ;;  %v276_v3 = vshll.u32 %v3076_v32, 16 }
  0x35   : > { %v282_v50 = vshll.u32 %v3082_v38, 16  ;;  %v2298_v52 = vrot.slane %v672_v40, 9  ;;  %v504_v53 = vsel %vm490_vm2, %v2276_v33, 0  ;;  %v3106_v54 = vrot.slane %v316_v36, 5 }
  0x36   : > { %v3109_v55 = vsel %vm490_vm2, %v2283_v37, 0  ;;  %v743_v56 = vrot.slane %v2946_v2, 5  ;;  %v2275_v59 = vcombine.low %v333_v45, %v343_v46  ;;  %v3112_v60 = vrot.slane %v303_v42, 4 }
  0x37   : > { %v313_v61 = vor.u32 %v312_v43, %v3085_v34  ;;  %v2297_v63 = vrot.slane %v671_v48, 9  ;;  %v736_v7 = vrot.slane %v2957_v11, 5  ;;  %v739_v8 = vrot.slane %v2960_v16, 5  ;;  %v666_v48 = vld [vmem:[%s2942_s8 + $0xc] sm:$0xe] }
  0x38   : > { %2577 = vmatpush3.bf16.xpose.msra.mxu0 %v507_v30  ;;  %2599 = vmatpush3.bf16.xpose.msra.mxu1 %v611_v31  ;;  %v3121_v5 = vsel %vm3101_vm7, %v2298_v52, %v743_v56  ;;  %v745_v6 = vrot.slane %v743_v56, 4  ;;  %v275_v12 = vrot.slane %v273_v49, 4  ;;  %v278_v2 = vrot.slane %v276_v3, 5  ;;  %v668_v30 = vld [vmem:[%s2942_s8 + $0x24] sm:$0xe] }
  0x39   : > { %2578 = vmatprep.subr.bf16.mxu0 %v2858_v0  ;;  %2600 = vmatprep.subr.bf16.mxu1 %v2858_v0  ;;  %v3125_v13 = vrot.slane %v282_v50, 5  ;;  %v286_v14 = vshrl.u32 %v3082_v38, 16  ;;  %v3135_v19 = vsel %vm3101_vm7, %v2297_v63, %v736_v7  ;;  %v738_v21 = vrot.slane %v736_v7, 4 }
  0x3a   : > { %v3131_v18 = vsel %vm3101_vm7, %v745_v6, %v746_v44  ;;  %v2296_v11 = vrot.slane %v670_v1, 9  ;;  %v292_v16 = vshll.u32 %v3117_v4, 16  ;;  %v729_v23 = vrot.slane %v2976_v35, 5 }
  0x3b   : > { %v2307_v22 = vcombine.low %v3121_v5, %v3131_v18  ;;  %v732_v24 = vrot.slane %v2980_v39, 5  ;;  %v501_v25 = vsel %vm490_vm2, %v2275_v59, 0  ;;  %v309_v27 = vsel %vm2968_vm4, %v3112_v60, %v3085_v34  ;;  %v667_v34 = vld [vmem:[%s2942_s8 + $0x18] sm:$0xe]  ;;  %v665_v59 = vld [vmem:[%s2942_s8] sm:$0xe] }
  0x3c   : > { %v3149_v10 = vsel %vm3101_vm7, %v738_v21, %v739_v8  ;;  %v2295_v29 = vrot.slane %v669_v17, 9  ;;  %v314_v35 = vrot.slane %v313_v61, 4  ;;  %v3158_v31 = vsel %vm3101_vm7, %v2296_v11, %v729_v23 }
  0x3d   : > { %v2306_v39 = vcombine.low %v3135_v19, %v3149_v10  ;;  %v731_v33 = vrot.slane %v729_v23, 4  ;;  %v288_v36 = vrot.slane %v286_v14, 4  ;;  %v2282_v37 = vcombine.low %v3076_v32, %v3082_v38  ;;  %v2806_v10 = vld [vmem:[%s2942_s8 + $0x30] sm:$0xff]  }
  0x3e   : > { %v722_v40 = vrot.slane %v2994_v57, 5  ;;  %v725_v42 = vrot.slane %v3000_v62, 5  ;;  %v279_v43 = vor.u32 %v278_v2, %v275_v12  ;;  %v2294_v45 = vrot.slane %v668_v30, 9 }
  0x3f   : > { %v3167_v44 = vsel %vm3101_vm7, %v731_v33, %v732_v24  ;;  %v715_v46 = vrot.slane %v3011_v15, 5  ;;  %v718_v62 = vrot.slane %v3021_v28, 5  ;;  %v319_v49 = vsel %vm2968_vm4, %v314_v35, %v3106_v54 }
  0x40   : > { %2579 = vmatpush3.bf16.xpose.msra.mxu0 %v504_v53  ;;  %2601 = vmatpush3.bf16.xpose.msra.mxu1 %v608_v47  ;;  %v2305_v47 = vcombine.low %v3158_v31, %v3167_v44  ;;  %v3174_v32 = vsel %vm3101_vm7, %v2295_v29, %v722_v40  ;;  %v724_v57 = vrot.slane %v722_v40, 4  ;;  %v2293_v50 = vrot.slane %v667_v34, 9  ;;  %v2272_v34 = vld [vmem:[%s3932_s1 + $0x4] sm:$0xf]  ;;  %v2358_v44 = vld [vmem:[%s2942_s8 + $0x60] sm:$0xf] }
  0x41   : > { %2580 = vmatprep.subr.bf16.mxu0 %v2858_v0  ;;  %2602 = vmatprep.subr.bf16.mxu1 %v2858_v0  ;;  %v3183_v3 = vsel %vm3101_vm7, %v2294_v45, %v715_v46  ;;  %v717_v15 = vrot.slane %v715_v46, 4  ;;  %v289_v52 = vor.u32 %v288_v36, %v3125_v13  ;;  %v708_v56 = vrot.slane %v3031_v41, 5  ;;  %v2802_v36 = vld [vmem:[%s2942_s8 + $0x60] sm:$0xff]   ;;  %v2804_v46 = vld [vmem:[%s2942_s8 + $0x48] sm:$0xff]  }
  0x42   : > { %v3188_v53 = vsel %vm3101_vm7, %v724_v57, %v725_v42  ;;  %v711_v28 = vrot.slane %v3049_v58, 5  ;;  %v294_v60 = vrot.slane %v292_v16, 5  ;;  %v2292_v63 = vrot.slane %v666_v48, 9  ;;  %v2803_v42 = vld [vmem:[%s2942_s8 + $0x54] sm:$0xff]   ;;  %v2807_v31 = vld [vmem:[%s2942_s8 + $0x24] sm:$0xff]  }
  0x43   : > { %v2304_v54 = vcombine.low %v3174_v32, %v3188_v53  ;;  %v3197_v61 = vsel %vm3101_vm7, %v717_v15, %v718_v62  ;;  %v3204_v41 = vsel %vm3101_vm7, %v2293_v50, %v708_v56  ;;  %v710_v58 = vrot.slane %v708_v56, 4  ;;  %v2808_v53 = vld [vmem:[%s2942_s8 + $0x18] sm:$0xff]   ;;  %v2360_v56 = vld [vmem:[%s2942_s8 + $0x68] sm:$0x1] }
  0x44   : > { %v2303_v1 = vcombine.low %v3183_v3, %v3197_v61  ;;  %v701_v6 = vrot.slane %v3055_v9, 5  ;;  %v2274_v7 = vcombine.low %v309_v27, %v319_v49  ;;  %v280_v8 = vrot.slane %v279_v43, 4  ;;  %v2355_v61 = vld [vmem:[%s2942_s8 + $0x54] sm:$0xf] }
  0x45   : > { %v704_v12 = vrot.slane %v3067_v20, 5  ;;  %v2291_v2 = vrot.slane %v665_v59, 9  ;;  %v3212_v14 = vsel %vm3101_vm7, %v710_v58, %v711_v28  ;;  %v694_v11 = vrot.slane %v3082_v38, 5 }
  0x46   : > { %v3216_v17 = vsel %vm3101_vm7, %v2292_v63, %v701_v6  ;;  %v703_v21 = vrot.slane %v701_v6, 4  ;;  %v2302_v9 = vcombine.low %v3204_v41, %v3212_v14  ;;  %v697_v16 = vrot.slane %v3117_v4, 5  ;;  %v2378_v63 = vld [vmem:[%s2942_s8 + $0x60] sm:$0xe]  ;;  %v2809_v41 = vld [vmem:[%s2942_s8 + $0xc] sm:$0xff]  }
  0x47   : > { %v602_v20 = vsel %vm490_vm2, %v2282_v37, 0  ;;  %v498_v24 = vsel %vm490_vm2, %v2274_v7, 0  ;;  %v3232_v27 = vsel %vm3101_vm7, %v2291_v2, %v694_v11  ;;  %v696_v29 = vrot.slane %v694_v11, 4 }
  0x48   : > { %2581 = vmatpush3.bf16.xpose.msra.mxu0 %v501_v25  ;;  %2603 = vmatpush3.bf16.xpose.msra.mxu1 %v3109_v55  ;;  %v290_v55 = vrot.slane %v289_v52, 4  ;;  %v3225_v23 = vsel %vm3101_vm7, %v703_v21, %v704_v12  ;;  %v285_v38 = vsel %vm2968_vm4, %v280_v8, %v3125_v13  ;;  %v260_v13 = vld [vmem:[%s3932_s1] sm:$0xf]  ;;  %v929_v40 = vsel %vm490_vm2, %v2802_v36, 0  ;;  %v3316_v12 = vld [vmem:[%s2942_s8 + $0x58] sm:$0xf] }
  0x49   : > { %2582 = vmatprep.subr.bf16.mxu0 %v2858_v0  ;;  %2604 = vmatprep.subr.bf16.mxu1 %v2858_v0  ;;  %v2301_v25 = vcombine.low %v3216_v17, %v3225_v23  ;;  %v3241_v30 = vsel %vm3101_vm7, %v696_v29, %v697_v16  ;;  %v799_v43 = vsel %vm490_vm2, %v2307_v22, 0  ;;  %v926_v45 = vsel %vm490_vm2, %v2803_v42, 0  ;;  %v2805_v22 = vld [vmem:[%s2942_s8 + $0x3c] sm:$0xff]   ;;  %v3323_v29 = vld [vmem:[%s2942_s8 + $0x4c] sm:$0xf] }
  0x4a   : > { %v295_v4 = vsel %vm2968_vm4, %v290_v55, %v294_v60  ;;  %v2300_v35 = vcombine.low %v3232_v27, %v3241_v30  ;;  %v796_v5 = vsel %vm490_vm2, %v2306_v39, 0  ;;  %v923_v18 = vsel %vm490_vm2, %v2804_v46, 0  ;;  %v3349_v23 = vld [vmem:[%s2942_s8 + $0x40] sm:$0xf]  ;;  %v2376_v30 = vld [vmem:[%s2942_s8 + $0x48] sm:$0xe] }
  0x4b   : > { %v2273_v33 = vcombine.low %v285_v38, %v295_v4  ;;  %v793_v57 = vsel %vm490_vm2, %v2305_v47, 0  ;;  %v920_v19 = vsel %vm490_vm2, %v2805_v22, 0  ;;  %v790_v39 = vsel %vm490_vm2, %v2304_v54, 0  ;;  %v2359_v47 = vld [vmem:[%s2942_s8 + $0x64] sm:$0xf] }
  0x4c   : > { %v917_v62 = vsel %vm490_vm2, %v2806_v10, 0  ;;  %v787_v32 = vsel %vm490_vm2, %v2303_v1, 0  ;;  %v914_v48 = vsel %vm490_vm2, %v2807_v31, 0  ;;  %v1165_v49 = vshrl.u32 %v2358_v44, 16 }
  0x4d   : > { %v495_v37 = vsel %vm490_vm2, %v2273_v33, 0  ;;  %v1168_v15 = vshll.u32 %v2358_v44, 16  ;;  %v1174_v50 = vshll.u32 %v2359_v47, 16  ;;  %v1178_v52 = vshrl.u32 %v2359_v47, 16  ;;  %v2349_v44 = vld [vmem:[%s2942_s8 + $0x3c] sm:$0xf] }
  0x4e   : > { %v1167_v3 = vrot.slane %v1165_v49, 4  ;;  %v1365_v54 = vrot.slane %v2359_v47, 5  ;;  %v784_v1 = vsel %vm490_vm2, %v2302_v9, 0  ;;  %v911_v58 = vsel %vm490_vm2, %v2808_v53, 0 }
  0x4f   : > { %v1170_v28 = vrot.slane %v1168_v15, 5  ;;  %v1176_v59 = vrot.slane %v1174_v50, 5  ;;  %v1180_v60 = vrot.slane %v1178_v52, 4  ;;  %v1184_v6 = vshll.u32 %v2360_v56, 16 }
  0x50   : > { %2583 = vmatpush3.bf16.xpose.msra.mxu0 %v498_v24  ;;  %2605 = vmatpush3.bf16.xpose.msra.mxu1 %v602_v20  ;;  %v1141_v2 = vshrl.u32 %v2355_v61, 16  ;;  %v1144_v55 = vshll.u32 %v2355_v61, 16  ;;  %v2386_v21 = vrot.slane %v2378_v63, 9  ;;  %v1367_v11 = vrot.slane %v1365_v54, 4  ;;  %v2352_v20 = vld [vmem:[%s2942_s8 + $0x48] sm:$0xf] }
  0x51   : > { %2584 = vmatprep.subr.bf16.mxu0 %v2858_v0  ;;  %2630 = vmatprep.subr.bf16.mxu1 %v2858_v0  ;;  %v1171_v7 = vor.u32 %v1170_v28, %v1167_v3  ;;  %v1181_v8 = vor.u32 %v1180_v60, %v1176_v59  ;;  %v1368_v16 = vrot.slane %v2360_v56, 5  ;;  %v1186_v14 = vrot.slane %v1184_v6, 5 }
  0x52   : > { %v1150_v9 = vshll.u32 %v3316_v12, 16  ;;  %v1154_v24 = vshrl.u32 %v3316_v12, 16  ;;  %v1143_v33 = vrot.slane %v1141_v2, 4  ;;  %v1146_v36 = vrot.slane %v1144_v55, 5  ;;  %v2346_v2 = vld [vmem:[%s2942_s8 + $0x30] sm:$0xf] }
  0x53   : > { %v1172_v38 = vrot.slane %v1171_v7, 4  ;;  %v1182_v4 = vrot.slane %v1181_v8, 4  ;;  %v1358_v42 = vrot.slane %v3316_v12, 5  ;;  %v1126_v46 = vshll.u32 %v3323_v29, 16 }
  0x54   : > { %v908_v22 = vsel %vm490_vm2, %v2809_v41, 0  ;;  %v1093_v3 = vshrl.u32 %v2349_v44, 16  ;;  %v1096_v28 = vshll.u32 %v2349_v44, 16  ;;  %v1106_v61 = vshrl.u32 %v3349_v23, 16 }
  0x55   : > { %v1177_v10 = vsel %vm2968_vm4, %v1172_v38, %v1176_v59  ;;  %v3354_v50 = vrot.slane %v1126_v46, 5  ;;  %v778_v59 = vsel %vm490_vm2, %v2300_v35, 0  ;;  %v2327_v35 = vld [vmem:[%s3932_s1 + $0xc] sm:$0xf]  ;;  %v1351_v12 = vrot.slane %v3323_v29, 5 }
  0x56   : > { %v2384_v41 = vrot.slane %v2376_v30, 9  ;;  %v1344_v38 = vrot.slane %v3349_v23, 5 }
  0x57   : > { %2607 = vmatmul.mubr.msk.bf16.vlgmr.msra.gmra.mxu1 %vm490_vm2, %v260_v13  ;;  %v1366_v13 = vsel %vm3101_vm7, %v2386_v21, %v1365_v54  ;;  %v1102_v54 = vshll.u32 %v3349_v23, 16 }
  0x58   : > { %2585 = vmatpush3.bf16.xpose.msra.mxu0 %v495_v37  ;;  %2631 = vmatpush3.bf16.xpose.msra.mxu1 %v929_v40  ;;  %v1369_v37 = vsel %vm3101_vm7, %v1367_v11, %v1368_v16  ;;  %v2357_v40 = vld [vmem:[%s2942_s8 + $0x5c] sm:$0x1]  ;;  %v2351_v11 = vld [vmem:[%s2942_s8 + $0x44] sm:$0x1]  ;;  %v1095_v16 = vrot.slane %v1093_v3, 4 }
  0x59   : > { %2610 = vmatprep.subr.bf16.mxu0 %v2858_v0  ;;  %2632 = vmatprep.subr.bf16.mxu1 %v2858_v0  ;;  %v1160_v31 = vshll.u32 %v2357_v40, 16  ;;  %v2395_v47 = vcombine.low %v1366_v13, %v1369_v37  ;;  %v1361_v17 = vrot.slane %v2357_v40, 5  ;;  %v1069_v13 = vshrl.u32 %v2346_v2, 16 }
  0x5a   : > { %2646 = vmatprep.mubr.msk.bf16.mxu1 %vm2859_vm0, %v2858_v0 }
  0x5b   : > { %v3363_v60 = vrot.slane %v1160_v31, 5  ;;  %v1421_v63 = vsel %vm490_vm2, %v2395_v47, 0  ;;  %v1071_v31 = vrot.slane %v1069_v13, 4  ;;  %v2299_v47 = vld [vmem:[%s3932_s1 + $0x8] sm:$0xf] }
  0x5f   : > { %2587 = vmatmul.mubr.msk.bf16.vlgmr.msra.gmra.mxu0 %vm490_vm2, %v2272_v34  ;;  %v2377_v34 = vld [vmem:[%s2942_s8 + $0x54] sm:$0xe] }
  0x60   : > { %2611 = vmatpush3.bf16.xpose.msra.mxu0 %v799_v43  ;;  %2633 = vmatpush3.bf16.xpose.msra.mxu1 %v926_v45  ;;  %v1117_v43 = vshrl.u32 %v2352_v20, 16  ;;  %v1120_v45 = vshll.u32 %v2352_v20, 16  ;;  %v1098_v20 = vrot.slane %v1096_v28, 5 }
  0x61   : > { %2612 = vmatprep.subr.bf16.mxu0 %v2858_v0  ;;  %2634 = vmatprep.subr.bf16.mxu1 %v2858_v0 }
  0x62   : > { %2626 = vmatprep.mubr.msk.bf16.mxu0 %vm2859_vm0, %v2858_v0  ;;  %v1119_v49 = vrot.slane %v1117_v43, 4  ;;  %v1122_v15 = vrot.slane %v1120_v45, 5  ;;  %v1099_v43 = vor.u32 %v1098_v20, %v1095_v16  ;;  %v1112_v45 = vshll.u32 %v2351_v11, 16 }
  0x64   : > { %v1123_v7 = vor.u32 %v1122_v15, %v1119_v49  ;;  %v1114_v49 = vrot.slane %v1112_v45, 5 }
  0x66   : > { %v1124_v37 = vrot.slane %v1123_v7, 4 }
  0x68   : > { %2613 = vmatpush3.bf16.xpose.msra.mxu0 %v796_v5  ;;  %2635 = vmatpush3.bf16.xpose.msra.mxu1 %v923_v18  ;;  %v1130_v5 = vshrl.u32 %v3323_v29, 16  ;;  %v781_v18 = vsel %vm490_vm2, %v2301_v25, 0  ;;  %v3352_v25 = vld [vmem:[%s2942_s8 + $0x50] sm:$0x1]  ;;  %v1072_v29 = vshll.u32 %v2346_v2, 16 }
  0x69   : > { %2614 = vmatprep.subr.bf16.mxu0 %v2858_v0  ;;  %2636 = vmatprep.subr.bf16.mxu1 %v2858_v0  ;;  %v1136_v27 = vshll.u32 %v3352_v25, 16 }
  0x6a   : > { %v1132_v52 = vrot.slane %v1130_v5, 4  ;;  %v1347_v5 = vrot.slane %v2351_v11, 5  ;;  %v1074_v44 = vrot.slane %v1072_v29, 5 }
  0x6c   : > { %v1133_v8 = vor.u32 %v1132_v52, %v3354_v50  ;;  %v2348_v52 = vld [vmem:[%s2942_s8 + $0x38] sm:$0x1] }
  0x6d   : > { %v1088_v7 = vshll.u32 %v2348_v52, 16 }
  0x6e   : > { %v1134_v40 = vrot.slane %v1133_v8, 4 }
  0x6f   : > { %v3462_v29 = vrot.slane %v1088_v7, 5 }
  0x70   : > { %2615 = vmatpush3.bf16.xpose.msra.mxu0 %v793_v57  ;;  %2637 = vmatpush3.bf16.xpose.msra.mxu1 %v920_v19  ;;  %v3341_v57 = vrot.slane %v1150_v9, 5  ;;  %v1156_v19 = vrot.slane %v1154_v24, 4  ;;  %v1108_v9 = vrot.slane %v1106_v61, 4  ;;  %v2375_v24 = vld [vmem:[%s2942_s8 + $0x3c] sm:$0xe] }
  0x71   : > { %2616 = vmatprep.subr.bf16.mxu0 %v2858_v0  ;;  %2638 = vmatprep.subr.bf16.mxu1 %v2858_v0  ;;  %v2383_v46 = vrot.slane %v2375_v24, 9 }
  0x72   : > { %v1157_v56 = vor.u32 %v1156_v19, %v3341_v57 }
  0x73   : > { %v1345_v15 = vsel %vm3101_vm7, %v2383_v46, %v1344_v38  ;;  %v3477_v46 = vld [vmem:[%s2942_s8 + $0x74] sm:$0x1] }
  0x74   : > { %v1158_v21 = vrot.slane %v1157_v56, 4 }
  0x78   : > { %2617 = vmatpush3.bf16.xpose.msra.mxu0 %v790_v39  ;;  %2639 = vmatpush3.bf16.xpose.msra.mxu1 %v917_v62  ;;  %v1187_v39 = vsel %vm2968_vm4, %v1182_v4, %v1186_v14  ;;  %v1147_v62 = vor.u32 %v1146_v36, %v1143_v33  ;;  %v3384_v14 = vrot.slane %v1102_v54, 5  ;;  %v1138_v33 = vrot.slane %v1136_v27, 5  ;;  %v3389_v36 = vld [vmem:[%s2942_s8 + $0x34] sm:$0xf] }
  0x79   : > { %2618 = vmatprep.subr.bf16.mxu0 %v2858_v0  ;;  %2640 = vmatprep.subr.bf16.mxu1 %v2858_v0  ;;  %v2369_v53 = vcombine.low %v1177_v10, %v1187_v39  ;;  %v1078_v19 = vshll.u32 %v3389_v36, 16  ;;  %v1082_v10 = vshrl.u32 %v3389_v36, 16  ;;  %v1075_v54 = vor.u32 %v1074_v44, %v1071_v31 }
  0x7a   : > { %v1139_v23 = vsel %vm2968_vm4, %v1134_v40, %v1138_v33  ;;  %v1337_v61 = vrot.slane %v3389_v36, 5  ;;  %v3469_v40 = vld [vmem:[%s2942_s8 + $0x70] sm:$0xf] }
  0x7b   : > { %v1239_v55 = vsel %vm490_vm2, %v2369_v53, 0  ;;  %v2343_v53 = vld [vmem:[%s2942_s8 + $0x24] sm:$0xf]  ;;  %v3426_v3 = vrot.slane %v1078_v19, 5  ;;  %v1084_v28 = vrot.slane %v1082_v10, 4  ;;  %v3445_v16 = vrot.slane %v1075_v54, 4 }
  0x7c   : > { %v1045_v27 = vshrl.u32 %v2343_v53, 16  ;;  %v1048_v30 = vshll.u32 %v2343_v53, 16  ;;  %v1339_v20 = vrot.slane %v1337_v61, 4  ;;  %v2340_v19 = vld [vmem:[%s2942_s8 + $0x18] sm:$0xf] }
  0x7d   : > { %v1085_v2 = vor.u32 %v1084_v28, %v3426_v3  ;;  %v3489_v10 = vld [vmem:[%s2942_s8 + $0x64] sm:$0xf]  ;;  %v1021_v53 = vshrl.u32 %v2340_v19, 16  ;;  %v3520_v54 = vld [vmem:[%s2942_s8 + $0x5c] sm:$0x1] }
  0x7e   : > { %v1050_v33 = vrot.slane %v1048_v30, 5 }
  0x80   : > { %2619 = vmatpush3.bf16.xpose.msra.mxu0 %v787_v32  ;;  %2641 = vmatpush3.bf16.xpose.msra.mxu1 %v914_v48  ;;  %v2385_v32 = vrot.slane %v2377_v34, 9  ;;  %v1360_v48 = vrot.slane %v1358_v42, 4  ;;  %v1354_v34 = vrot.slane %v3352_v25, 5  ;;  %v1100_v25 = vrot.slane %v1099_v43, 4 }
  0x81   : > { %2620 = vmatprep.subr.bf16.mxu0 %v2858_v0  ;;  %2642 = vmatprep.subr.bf16.mxu1 %v2858_v0 }
  0x82   : > { %v1362_v6 = vsel %vm3101_vm7, %v1360_v48, %v1361_v17  ;;  %v1352_v48 = vsel %vm3101_vm7, %v2384_v41, %v1351_v12  ;;  %v1340_v41 = vrot.slane %v2348_v52, 5 }
  0x88   : > { %2621 = vmatpush3.bf16.xpose.msra.mxu0 %v784_v1  ;;  %2643 = vmatpush3.bf16.xpose.msra.mxu1 %v911_v58  ;;  %v3368_v1 = vrot.slane %v1147_v62, 4  ;;  %v1359_v58 = vsel %vm3101_vm7, %v2385_v32, %v1358_v42  ;;  %v1353_v42 = vrot.slane %v1351_v12, 4  ;;  %v1163_v62 = vsel %vm2968_vm4, %v1158_v21, %v3363_v60 }
  0x89   : > { %2622 = vmatprep.subr.bf16.mxu0 %v2858_v0  ;;  %2644 = vmatprep.subr.bf16.mxu1 %v2858_v0  ;;  %v2394_v4 = vcombine.low %v1359_v58, %v1362_v6 }
  0x8a   : > { %v1153_v39 = vsel %vm2968_vm4, %v3368_v1, %v3341_v57  ;;  %v1129_v57 = vsel %vm2968_vm4, %v1124_v37, %v3354_v50  ;;  %v1355_v17 = vsel %vm3101_vm7, %v1353_v42, %v1354_v34  ;;  %v2465_v42 = vld [vmem:[%s2942_s8 + $0x60] sm:$0xe]  ;;  %v3472_v34 = vrot.slane %v1085_v2, 4 }
  0x8b   : > { %v1418_v32 = vsel %vm490_vm2, %v2394_v4, 0  ;;  %v2368_v60 = vcombine.low %v1153_v39, %v1163_v62  ;;  %v2367_v1 = vcombine.low %v1129_v57, %v1139_v23  ;;  %v2393_v58 = vcombine.low %v1352_v48, %v1355_v17  ;;  %v2373_v48 = vld [vmem:[%s2942_s8 + $0x24] sm:$0xe]  ;;  %v3501_v23 = vld [vmem:[%s2942_s8 + $0x1c] sm:$0xf] }
  0x8c   : > { %v1047_v4 = vrot.slane %v1045_v27, 4  ;;  %v1987_v39 = vrot.slane %v3469_v40, 5  ;;  %v1990_v62 = vrot.slane %v3477_v46, 5  ;;  %v1980_v57 = vrot.slane %v3489_v10, 5 }
  0x8d   : > { %v1236_v11 = vsel %vm490_vm2, %v2368_v60, 0  ;;  %v1415_v24 = vsel %vm490_vm2, %v2393_v58, 0  ;;  %v1024_v60 = vshll.u32 %v2340_v19, 16  ;;  %v1030_v58 = vshll.u32 %v3501_v23, 16  ;;  %v3567_v19 = vld [vmem:[%s2942_s8 + $0x50] sm:$0x1] }
  0x8e   : > { %v1051_v31 = vor.u32 %v1050_v33, %v1047_v4  ;;  %v1982_v28 = vrot.slane %v1980_v57, 4  ;;  %v1091_v2 = vsel %vm2968_vm4, %v3472_v34, %v3462_v29  ;;  %v2372_v29 = vld [vmem:[%s2942_s8 + $0x18] sm:$0xe]  ;;  %v3556_v34 = vld [vmem:[%s2942_s8 + $0x4c] sm:$0xf] }
  0x90   : > { %2623 = vmatpush3.bf16.xpose.msra.mxu0 %v781_v18  ;;  %2645 = vmatpush3.bf16.xpose.msra.mxu1 %v908_v22  ;;  %v1109_v18 = vor.u32 %v1108_v9, %v3384_v14  ;;  %v1346_v22 = vrot.slane %v1344_v38, 4  ;;  %v3451_v9 = vsel %vm490_vm2, %v2367_v1, 0  ;;  %v3455_v38 = vld [vmem:[%s2942_s8 + $0x2c] sm:$0x1] }
  0x91   : > { %2624 = vmatprep.subr.bf16.mxu0 %v2858_v0  ;;  %2670 = vmatprep.subr.bf16.mxu1 %v2858_v0  ;;  %v1064_v44 = vshll.u32 %v3455_v38, 16 }
  0x92   : > { %v1110_v56 = vrot.slane %v1109_v18, 4  ;;  %v1348_v50 = vsel %vm3101_vm7, %v1346_v22, %v1347_v5  ;;  %v1081_v18 = vsel %vm2968_vm4, %v3445_v16, %v3426_v3  ;;  %v3485_v22 = vsel %vm3101_vm7, %v1339_v20, %v1340_v41 }
  0x93   : > { %v2392_v6 = vcombine.low %v1345_v15, %v1348_v50  ;;  %v1052_v20 = vrot.slane %v1051_v31, 4  ;;  %v1969_v31 = vrot.slane %v3567_v19, 5 }
  0x94   : > { %v1115_v12 = vsel %vm2968_vm4, %v1110_v56, %v1114_v49  ;;  %v1989_v49 = vrot.slane %v1987_v39, 4  ;;  %v3512_v56 = vld [vmem:[%s2942_s8 + $0x58] sm:$0xf] }
  0x95   : > { %v3460_v13 = vsel %vm490_vm2, %v2392_v6, 0  ;;  %v1973_v1 = vrot.slane %v3512_v56, 5  ;;  %v1034_v6 = vshrl.u32 %v3501_v23, 16 }
  0x97   : > { %2647 = vmatmul.mubr.msk.bf16.vlgmr.msra.gmra.mxu1 %vm490_vm2, %v2327_v35  ;;  %v1105_v35 = vsel %vm2968_vm4, %v1100_v25, %v3384_v14  ;;  %v2466_v14 = vld [vmem:[%s2942_s8 + $0x6c] sm:$0xe] }
  0x98   : > { %2625 = vmatpush3.bf16.xpose.msra.mxu0 %v778_v59  ;;  %2671 = vmatpush3.bf16.xpose.msra.mxu1 %v1421_v63  ;;  %v2374_v59 = vld [vmem:[%s2942_s8 + $0x30] sm:$0xe]  ;;  %v3431_v63 = vld [vmem:[%s2942_s8 + $0x28] sm:$0xf]  ;;  %v3457_v36 = vcombine.low %v1105_v35, %v1115_v12  ;;  %v2474_v5 = vrot.slane %v2466_v14, 9  ;;  %v1976_v35 = vrot.slane %v3520_v54, 5 }
  0x99   : > { %2650 = vmatprep.subr.bf16.mxu0 %v2858_v0  ;;  %2672 = vmatprep.subr.bf16.mxu1 %v2858_v0  ;;  %v2382_v8 = vrot.slane %v2374_v59, 9  ;;  %v1058_v21 = vshrl.u32 %v3431_v63, 16  ;;  %v1330_v17 = vrot.slane %v3431_v63, 5  ;;  %v2464_v59 = vld [vmem:[%s2942_s8 + $0x54] sm:$0xe]  ;;  %v1975_v12 = vrot.slane %v1973_v1, 4 }
  0x9a   : > { %2686 = vmatprep.mubr.msk.bf16.mxu1 %vm2859_vm0, %v2858_v0  ;;  %v3505_v25 = vsel %vm3101_vm7, %v2474_v5, %v1987_v39  ;;  %v1333_v14 = vrot.slane %v3455_v38, 5  ;;  %v1230_v38 = vsel %vm490_vm2, %v3457_v36, 0  ;;  %v3564_v5 = vrot.slane %v1030_v58, 5 }
  0x9b   : > { %v3466_v37 = vsel %vm3101_vm7, %v2382_v8, %v1337_v61  ;;  %v1060_v45 = vrot.slane %v1058_v21, 4  ;;  %v3524_v61 = vsel %vm3101_vm7, %v1989_v49, %v1990_v62  ;;  %v1066_v21 = vrot.slane %v1064_v44, 5  ;;  %v2463_v62 = vld [vmem:[%s2942_s8 + $0x48] sm:$0xe] }
  0x9c   : > { %v2483_v27 = vcombine.low %v3505_v25, %v3524_v61  ;;  %v1332_v41 = vrot.slane %v1330_v17, 4  ;;  %v3552_v4 = vsel %vm3101_vm7, %v1975_v12, %v1976_v35  ;;  %v1966_v39 = vrot.slane %v3556_v34, 5 }
  0x9d   : > { %v2471_v3 = vrot.slane %v2463_v62, 9 }
  0x9e   : > { %v1968_v16 = vrot.slane %v1966_v39, 4 }
  0x9f   : > { %2627 = vmatmul.mubr.msk.bf16.vlgmr.msra.gmra.mxu0 %vm490_vm2, %v2299_v47  ;;  %v3495_v47 = vld [vmem:[%s2942_s8 + $0x68] sm:$0x1] }
  0xa0   : > { %2651 = vmatpush3.bf16.xpose.msra.mxu0 %v1239_v55  ;;  %2673 = vmatpush3.bf16.xpose.msra.mxu1 %v1418_v32  ;;  %v1054_v55 = vshll.u32 %v3431_v63, 16  ;;  %v2473_v32 = vrot.slane %v2465_v42, 9  ;;  %v1983_v15 = vrot.slane %v3495_v47, 5  ;;  %v2472_v63 = vrot.slane %v2464_v59, 9 }
  0xa1   : > { %2652 = vmatprep.subr.bf16.mxu0 %v2858_v0  ;;  %2674 = vmatprep.subr.bf16.mxu1 %v2858_v0  ;;  %v1023_v42 = vrot.slane %v1021_v53, 4 }
  0xa2   : > { %2666 = vmatprep.mubr.msk.bf16.mxu0 %vm2859_vm0, %v2858_v0  ;;  %v3474_v43 = vrot.slane %v1054_v55, 5  ;;  %v3516_v50 = vsel %vm3101_vm7, %v2473_v32, %v1980_v57  ;;  %v3532_v30 = vsel %vm3101_vm7, %v1982_v28, %v1983_v15  ;;  %v3540_v8 = vsel %vm3101_vm7, %v2472_v63, %v1973_v1  ;;  %v2337_v57 = vld [vmem:[%s2942_s8 + $0xc] sm:$0xf]  ;;  %v3603_v63 = vld [vmem:[%s2942_s8 + $0x10] sm:$0xf] }
  0xa3   : > { %v2482_v7 = vcombine.low %v3516_v50, %v3532_v30  ;;  %v2391_v55 = vcombine.low %v3466_v37, %v3485_v22  ;;  %v2481_v37 = vcombine.low %v3540_v8, %v3552_v4  ;;  %v1036_v22 = vrot.slane %v1034_v6, 4 }
  0xa4   : > { %v1061_v52 = vor.u32 %v1060_v45, %v3474_v43  ;;  %v1026_v45 = vrot.slane %v1024_v60, 5  ;;  %v1057_v44 = vsel %vm2968_vm4, %v1052_v20, %v3474_v43  ;;  %v2380_v43 = vrot.slane %v2372_v29, 9 }
  0xa5   : > { %v1409_v36 = vsel %vm490_vm2, %v2391_v55, 0  ;;  %v1037_v15 = vor.u32 %v1036_v22, %v3564_v5  ;;  %v997_v59 = vshrl.u32 %v2337_v57, 16  ;;  %v1000_v1 = vshll.u32 %v2337_v57, 16  ;;  %v3608_v55 = vld [vmem:[%s2942_s8 + $0x40] sm:$0xf] }
  0xa6   : > { %v1062_v33 = vrot.slane %v1061_v52, 4  ;;  %v3598_v52 = vsel %vm3101_vm7, %v1968_v16, %v1969_v31  ;;  %v1010_v22 = vshrl.u32 %v3603_v63, 16  ;;  %v1316_v62 = vrot.slane %v3603_v63, 5 }
  0xa7   : > { %v1800_v57 = vshrl.u32 %v3469_v40, 16  ;;  %v2040_v25 = vsel %vm490_vm2, %v2482_v7, 0  ;;  %v2037_v61 = vsel %vm490_vm2, %v2481_v37, 0 }
  0xa8   : > { %2653 = vmatpush3.bf16.xpose.msra.mxu0 %v1236_v11  ;;  %2675 = vmatpush3.bf16.xpose.msra.mxu1 %v1415_v24  ;;  %v2381_v11 = vrot.slane %v2373_v48, 9  ;;  %v2342_v24 = vld [vmem:[%s2942_s8 + $0x20] sm:$0x1]  ;;  %v1334_v48 = vsel %vm3101_vm7, %v1332_v41, %v1333_v14  ;;  %v3613_v41 = vld [vmem:[%s2942_s8 + $0x44] sm:$0x1]  ;;  %v1959_v14 = vrot.slane %v3608_v55, 5 }
  0xa9   : > { %2654 = vmatprep.subr.bf16.mxu0 %v2858_v0  ;;  %2676 = vmatprep.subr.bf16.mxu1 %v2858_v0  ;;  %v1040_v49 = vshll.u32 %v2342_v24, 16  ;;  %v1326_v28 = vrot.slane %v2342_v24, 5  ;;  %v1962_v29 = vrot.slane %v3613_v41, 5 }
  0xaa   : > { %v1331_v32 = vsel %vm3101_vm7, %v2381_v11, %v1330_v17  ;;  %v3594_v17 = vsel %vm3101_vm7, %v2471_v3, %v1966_v39  ;;  %v1038_v11 = vrot.slane %v1037_v15, 4 }
  0xab   : > { %v2480_v60 = vcombine.low %v3594_v17, %v3598_v52  ;;  %v2390_v6 = vcombine.low %v1331_v32, %v1334_v48  ;;  %v1042_v12 = vrot.slane %v1040_v49, 5  ;;  %v1796_v32 = vshll.u32 %v3469_v40, 16  ;;  %v2339_v49 = vld [vmem:[%s2942_s8 + $0x14] sm:$0x1]  ;;  %v2475_v52 = vld [vmem:[%s3932_s1 + $0x20] sm:$0xf] }
  0xad   : > { %v1043_v48 = vsel %vm2968_vm4, %v1038_v11, %v1042_v12  ;;  %v1802_v11 = vrot.slane %v1800_v57, 4 }
  0xb0   : > { %2655 = vmatpush3.bf16.xpose.msra.mxu0 %v3451_v9  ;;  %2677 = vmatpush3.bf16.xpose.msra.mxu1 %v3460_v13  ;;  %v2365_v9 = vcombine.low %v1081_v18, %v1091_v2  ;;  %v1323_v13 = vrot.slane %v3501_v23, 5  ;;  %v1067_v18 = vsel %vm2968_vm4, %v1062_v33, %v1066_v21  ;;  %v1027_v23 = vor.u32 %v1026_v45, %v1023_v42  ;;  %v2446_v2 = vld [vmem:[%s2942_s8 + $0x6c] sm:$0xf]  ;;  %v2462_v45 = vld [vmem:[%s2942_s8 + $0x3c] sm:$0xe] }
  0xb1   : > { %2656 = vmatprep.subr.bf16.mxu0 %v2858_v0  ;;  %2678 = vmatprep.subr.bf16.mxu1 %v2858_v0  ;;  %v2364_v35 = vcombine.low %v1057_v44, %v1067_v18  ;;  %v999_v33 = vrot.slane %v997_v59, 4  ;;  %v1006_v42 = vshll.u32 %v3603_v63, 16  ;;  %v2470_v39 = vrot.slane %v2462_v45, 9  ;;  %v2461_v45 = vld [vmem:[%s2942_s8 + $0x30] sm:$0xe] }
  0xb2   : > { %v1325_v53 = vrot.slane %v1323_v13, 4  ;;  %v1227_v58 = vsel %vm490_vm2, %v2365_v9, 0  ;;  %v1028_v21 = vrot.slane %v1027_v23, 4  ;;  %v1324_v20 = vsel %vm3101_vm7, %v2380_v43, %v1323_v13  ;;  %v2371_v13 = vld [vmem:[%s2942_s8 + $0xc] sm:$0xe] }
  0xb3   : > { %v1961_v9 = vrot.slane %v1959_v14, 4  ;;  %v1787_v31 = vshrl.u32 %v2446_v2, 16  ;;  %v1790_v44 = vshll.u32 %v2446_v2, 16  ;;  %v3631_v3 = vsel %vm3101_vm7, %v2470_v39, %v1959_v14  ;;  %v3649_v2 = vld [vmem:[%s2942_s8 + $0x34] sm:$0xf] }
  0xb4   : > { %v1327_v24 = vsel %vm3101_vm7, %v1325_v53, %v1326_v28  ;;  %v1033_v18 = vsel %vm2968_vm4, %v1028_v21, %v3564_v5  ;;  %v3645_v43 = vrot.slane %v1006_v42, 5  ;;  %v1012_v53 = vrot.slane %v1010_v22, 4  ;;  %v2443_v5 = vld [vmem:[%s2942_s8 + $0x60] sm:$0xf] }
  0xb5   : > { %v3635_v16 = vsel %vm3101_vm7, %v1961_v9, %v1962_v29  ;;  %v2389_v23 = vcombine.low %v1324_v20, %v1327_v24  ;;  %v2379_v28 = vrot.slane %v2371_v13, 9  ;;  %v1318_v59 = vrot.slane %v1316_v62, 4  ;;  %v3655_v20 = vld [vmem:[%s2942_s8 + $0x38] sm:$0x1] }
  0xb6   : > { %v2479_v40 = vcombine.low %v3631_v3, %v3635_v16  ;;  %v1319_v63 = vrot.slane %v2339_v49, 5  ;;  %v1224_v12 = vsel %vm490_vm2, %v2364_v35, 0  ;;  %v3652_v21 = vrot.slane %v1796_v32, 5 }
  0xb7   : > { %v1952_v14 = vrot.slane %v3649_v2, 5  ;;  %v2363_v24 = vcombine.low %v1033_v18, %v1043_v48  ;;  %v1016_v42 = vshll.u32 %v2339_v49, 16  ;;  %v1013_v29 = vor.u32 %v1012_v53, %v3645_v43 }
  0xb8   : > { %2657 = vmatpush3.bf16.xpose.msra.mxu0 %v1230_v38  ;;  %2679 = vmatpush3.bf16.xpose.msra.mxu1 %v1409_v36  ;;  %v1002_v38 = vrot.slane %v1000_v1, 5  ;;  %v1406_v36 = vsel %vm490_vm2, %v2390_v6, 0  ;;  %v1789_v1 = vrot.slane %v1787_v31, 4  ;;  %v1792_v6 = vrot.slane %v1790_v44, 5 }
  0xb9   : > { %2658 = vmatprep.subr.bf16.mxu0 %v2858_v0  ;;  %2680 = vmatprep.subr.bf16.mxu1 %v2858_v0  ;;  %v1954_v22 = vrot.slane %v1952_v14, 4  ;;  %v1317_v39 = vsel %vm3101_vm7, %v2379_v28, %v1316_v62  ;;  %v1320_v9 = vsel %vm3101_vm7, %v1318_v59, %v1319_v63  ;;  %v1806_v13 = vshll.u32 %v3477_v46, 16  ;;  %v2440_v63 = vld [vmem:[%s2942_s8 + $0x54] sm:$0xf] }
  0xba   : > { %v1003_v15 = vor.u32 %v1002_v38, %v999_v33  ;;  %v1403_v33 = vsel %vm490_vm2, %v2389_v23, 0  ;;  %v2469_v38 = vrot.slane %v2461_v45, 9  ;;  %v1803_v31 = vor.u32 %v1802_v11, %v3652_v21  ;;  %v3691_v11 = vld [vmem:[%s2942_s8 + $0x2c] sm:$0x1]  ;;  %v2460_v45 = vld [vmem:[%s2942_s8 + $0x24] sm:$0xe] }
  0xbb   : > { %v1763_v44 = vshrl.u32 %v2443_v5, 16  ;;  %v1766_v62 = vshll.u32 %v2443_v5, 16  ;;  %v1772_v18 = vshll.u32 %v3489_v10, 16  ;;  %v1776_v48 = vshrl.u32 %v3489_v10, 16 }
  0xbc   : > { %v1004_v35 = vrot.slane %v1003_v15, 4  ;;  %v3672_v32 = vsel %vm3101_vm7, %v2469_v38, %v1952_v14  ;;  %v1221_v23 = vsel %vm490_vm2, %v2363_v24, 0  ;;  %v1018_v49 = vrot.slane %v1016_v42, 5 }
  0xbd   : > { %v1014_v53 = vrot.slane %v1013_v29, 4  ;;  %v2388_v28 = vcombine.low %v1317_v39, %v1320_v9  ;;  %v1808_v59 = vrot.slane %v1806_v13, 5  ;;  %v1765_v5 = vrot.slane %v1763_v44, 4 }
  0xbe   : > { %v1009_v15 = vsel %vm2968_vm4, %v1004_v35, %v3645_v43  ;;  %v1768_v43 = vrot.slane %v1766_v62, 5  ;;  %v3696_v24 = vrot.slane %v1772_v18, 5  ;;  %v1778_v42 = vrot.slane %v1776_v48, 4 }
  0xbf   : > { %v2468_v35 = vrot.slane %v2460_v45, 9  ;;  %v1019_v38 = vsel %vm2968_vm4, %v1014_v53, %v1018_v49  ;;  %v1748_v39 = vshll.u32 %v3512_v56, 16  ;;  %v1752_v9 = vshrl.u32 %v3512_v56, 16 }
  0xc0   : > { %2659 = vmatpush3.bf16.xpose.msra.mxu0 %v1227_v58  ;;  %2681 = vmatpush3.bf16.xpose.msra.mxu1 %v1406_v36  ;;  %v1955_v58 = vrot.slane %v3655_v20, 5  ;;  %v1793_v36 = vor.u32 %v1792_v6, %v1789_v1  ;;  %v3688_v1 = vld [vmem:[%s2942_s8 + $0x28] sm:$0xf]  ;;  %v1804_v6 = vrot.slane %v1803_v31, 4  ;;  %v1782_v13 = vshll.u32 %v3495_v47, 16 }
  0xc1   : > { %2660 = vmatprep.subr.bf16.mxu0 %v2858_v0  ;;  %2682 = vmatprep.subr.bf16.mxu1 %v2858_v0  ;;  %v1945_v14 = vrot.slane %v3688_v1, 5  ;;  %v1769_v18 = vor.u32 %v1768_v43, %v1765_v5  ;;  %v1779_v56 = vor.u32 %v1778_v42, %v3696_v24  ;;  %v3722_v49 = vrot.slane %v1748_v39, 5 }
  0xc2   : > { %v3676_v57 = vsel %vm3101_vm7, %v1954_v22, %v1955_v58  ;;  %v1794_v10 = vrot.slane %v1793_v36, 4  ;;  %v1948_v58 = vrot.slane %v3691_v11, 5  ;;  %v1400_v22 = vsel %vm490_vm2, %v2388_v28, 0  ;;  %v2437_v28 = vld [vmem:[%s2942_s8 + $0x48] sm:$0xf] }
  0xc3   : > { %v2478_v46 = vcombine.low %v3672_v32, %v3676_v57  ;;  %v1947_v29 = vrot.slane %v1945_v14, 4  ;;  %v3711_v31 = vsel %vm3101_vm7, %v2468_v35, %v1945_v14  ;;  %v1809_v62 = vsel %vm2968_vm4, %v1804_v6, %v1808_v59  ;;  %v3729_v6 = vld [vmem:[%s2942_s8 + $0x20] sm:$0x1] }
  0xc4   : > { %v1799_v36 = vsel %vm2968_vm4, %v1794_v10, %v3652_v21  ;;  %v1754_v53 = vrot.slane %v1752_v9, 4  ;;  %v2362_v10 = vcombine.low %v1009_v15, %v1019_v38  ;;  %v1784_v59 = vrot.slane %v1782_v13, 5  ;;  %v2387_v9 = vld [vmem:[%s3932_s1 + $0x14] sm:$0xf] }
  0xc5   : > { %v3715_v44 = vsel %vm3101_vm7, %v1947_v29, %v1948_v58  ;;  %v2457_v14 = vcombine.low %v1799_v36, %v1809_v62  ;;  %v1770_v43 = vrot.slane %v1769_v18, 4  ;;  %v1780_v42 = vrot.slane %v1779_v56, 4  ;;  %v2459_v58 = vld [vmem:[%s2942_s8 + $0x18] sm:$0xe] }
  0xc6   : > { %v2477_v21 = vcombine.low %v3711_v31, %v3715_v44  ;;  %v1758_v45 = vshll.u32 %v3520_v54, 16  ;;  %v1715_v15 = vshrl.u32 %v2437_v28, 16  ;;  %v1755_v29 = vor.u32 %v1754_v53, %v3722_v49 }
  0xc7   : > { %v1718_v38 = vshll.u32 %v2437_v28, 16  ;;  %v1728_v39 = vshrl.u32 %v3556_v34, 16  ;;  %v1218_v13 = vsel %vm490_vm2, %v2362_v10, 0  ;;  %v1861_v62 = vsel %vm490_vm2, %v2457_v14, 0 }
  0xc8   : > { %2661 = vmatpush3.bf16.xpose.msra.mxu0 %v1224_v12  ;;  %2683 = vmatpush3.bf16.xpose.msra.mxu1 %v1403_v33  ;;  %v1739_v12 = vshrl.u32 %v2440_v63, 16  ;;  %v1742_v33 = vshll.u32 %v2440_v63, 16  ;;  %v3726_v63 = vld [vmem:[%s2942_s8 + $0x1c] sm:$0xf]  ;;  %v1785_v56 = vsel %vm2968_vm4, %v1780_v42, %v1784_v59  ;;  %v1760_v51 = vrot.slane %v1758_v45, 5 }
  0xc9   : > { %2662 = vmatprep.subr.bf16.mxu0 %v2858_v0  ;;  %2684 = vmatprep.subr.bf16.mxu1 %v2858_v0  ;;  %v1938_v5 = vrot.slane %v3726_v63, 5  ;;  %v1756_v53 = vrot.slane %v1755_v29, 4  ;;  %v1720_v28 = vrot.slane %v1718_v38, 5  ;;  %v1730_v14 = vrot.slane %v1728_v39, 4  ;;  %v2811_v38 = vld [vmem:[%s2942_s8 + $0x60] sm:$0xff]  }
  0xca   : > { %v1741_v48 = vrot.slane %v1739_v12, 4  ;;  %v1744_v47 = vrot.slane %v1742_v33, 5  ;;  %v1941_v12 = vrot.slane %v3729_v6, 5  ;;  %v2467_v33 = vrot.slane %v2459_v58, 9 }
  0xcb   : > { %v1940_v35 = vrot.slane %v1938_v5, 4  ;;  %v1734_v59 = vshll.u32 %v3567_v19, 16  ;;  %v1761_v45 = vsel %vm2968_vm4, %v1756_v53, %v1760_v51  ;;  %v1700_v19 = vshll.u32 %v3608_v55, 16 }
  0xcc   : > { %v3745_v54 = vsel %vm3101_vm7, %v2467_v33, %v1938_v5  ;;  %v1548_v51 = vsel %vm490_vm2, %v2811_v38, 0  ;;  %v1710_v53 = vshll.u32 %v3613_v41, 16  ;;  %v2031_v50 = vsel %vm490_vm2, %v2479_v40, 0 }
  0xcd   : > { %v3749_v36 = vsel %vm3101_vm7, %v1940_v35, %v1941_v12  ;;  %v1704_v35 = vshrl.u32 %v3608_v55, 16  ;;  %v2431_v55 = vld [vmem:[%s2942_s8 + $0x30] sm:$0xf]  ;;  %v2028_v30 = vsel %vm490_vm2, %v2478_v46, 0  ;;  %v2025_v7 = vsel %vm490_vm2, %v2477_v21, 0 }
  0xce   : > { %v2476_v18 = vcombine.low %v3745_v54, %v3749_v36 }
  0xd0   : > { %2663 = vmatpush3.bf16.xpose.msra.mxu0 %v1221_v23  ;;  %2685 = vmatpush3.bf16.xpose.msra.mxu1 %v1400_v22  ;;  %v1745_v23 = vor.u32 %v1744_v47, %v1741_v48  ;;  %v1724_v22 = vshll.u32 %v3556_v34, 16  ;;  %v1775_v34 = vsel %vm2968_vm4, %v1770_v43, %v3696_v24  ;;  %v1717_v47 = vrot.slane %v1715_v15, 4  ;;  %v2810_v24 = vld [vmem:[%s2942_s8 + $0x6c] sm:$0xff]   ;;  %v2434_v43 = vld [vmem:[%s2942_s8 + $0x3c] sm:$0xf] }
  0xd1   : > { %2664 = vmatprep.subr.bf16.mxu0 %v2858_v0  ;;  %2710 = vmatprep.subr.bf16.mxu1 %v2858_v0  ;;  %v2456_v5 = vcombine.low %v1775_v34, %v1785_v56  ;;  %v1691_v15 = vshrl.u32 %v2434_v43, 16  ;;  %v1694_v33 = vshll.u32 %v2434_v43, 16  ;;  %v1551_v29 = vsel %vm490_vm2, %v2810_v24, 0 }
  0xd2   : > { %v1746_v48 = vrot.slane %v1745_v23, 4  ;;  %v1726_v10 = vrot.slane %v1724_v22, 5  ;;  %v1721_v58 = vor.u32 %v1720_v28, %v1717_v47  ;;  %v2361_v23 = vld [vmem:[%s3932_s1 + $0x10] sm:$0xf]  ;;  %v1702_v56 = vrot.slane %v1700_v19, 5 }
  0xd3   : > { %v1696_v34 = vrot.slane %v1694_v33, 5  ;;  %v1667_v43 = vshrl.u32 %v2431_v55, 16  ;;  %v2022_v8 = vsel %vm490_vm2, %v2476_v18, 0 }
  0xd4   : > { %v1751_v42 = vsel %vm2968_vm4, %v1746_v48, %v3722_v49  ;;  %v1731_v12 = vor.u32 %v1730_v14, %v1726_v10  ;;  %v1858_v49 = vsel %vm490_vm2, %v2456_v5, 0  ;;  %v1722_v39 = vrot.slane %v1721_v58, 4  ;;  %v2812_v58 = vld [vmem:[%s2942_s8 + $0x54] sm:$0xff]  }
  0xd5   : > { %v2455_v22 = vcombine.low %v1751_v42, %v1761_v45  ;;  %v1706_v48 = vrot.slane %v1704_v35, 4  ;;  %v1676_v42 = vshll.u32 %v3649_v2, 16  ;;  %v1680_v45 = vshrl.u32 %v3649_v2, 16 }
  0xd6   : > { %v1727_v28 = vsel %vm2968_vm4, %v1722_v39, %v1726_v10  ;;  %v1669_v10 = vrot.slane %v1667_v43, 4  ;;  %v1686_v39 = vshll.u32 %v3655_v20, 16  ;;  %v2425_v43 = vld [vmem:[%s2942_s8 + $0x18] sm:$0xf] }
  0xd7   : > { %2687 = vmatmul.mubr.msk.bf16.vlgmr.msra.gmra.mxu1 %vm490_vm2, %v2387_v9  ;;  %v1732_v9 = vrot.slane %v1731_v12, 4  ;;  %v1855_v47 = vsel %vm490_vm2, %v2455_v22, 0  ;;  %v1707_v5 = vor.u32 %v1706_v48, %v1702_v56  ;;  %v1678_v19 = vrot.slane %v1676_v42, 5 }
  0xd8   : > { %2665 = vmatpush3.bf16.xpose.msra.mxu0 %v1218_v13  ;;  %2711 = vmatpush3.bf16.xpose.msra.mxu1 %v1861_v62  ;;  %v1736_v13 = vrot.slane %v1734_v59, 5  ;;  %v1693_v62 = vrot.slane %v1691_v15, 4  ;;  %v1670_v59 = vshll.u32 %v2431_v55, 16  ;;  %v1712_v15 = vrot.slane %v1710_v53, 5 }
  0xd9   : > { %2690 = vmatprep.subr.bf16.mxu0 %v2858_v0  ;;  %2712 = vmatprep.subr.bf16.mxu1 %v2858_v0  ;;  %v1682_v35 = vrot.slane %v1680_v45, 4  ;;  %v1652_v48 = vshll.u32 %v3688_v1, 16  ;;  %v1656_v55 = vshrl.u32 %v3688_v1, 16  ;;  %v1688_v53 = vrot.slane %v1686_v39, 5 }
  0xda   : > { %2726 = vmatprep.mubr.msk.bf16.mxu1 %vm2859_vm0, %v2858_v0  ;;  %v1737_v14 = vsel %vm2968_vm4, %v1732_v9, %v1736_v13  ;;  %v1697_v24 = vor.u32 %v1696_v34, %v1693_v62  ;;  %v1672_v33 = vrot.slane %v1670_v59, 5  ;;  %v1662_v42 = vshll.u32 %v3691_v11, 16 }
  0xdb   : > { %v2454_v12 = vcombine.low %v1727_v28, %v1737_v14  ;;  %v1683_v13 = vor.u32 %v1682_v35, %v1678_v19  ;;  %v2814_v35 = vld [vmem:[%s2942_s8 + $0x3c] sm:$0xff]  }
  0xdc   : > { %v1698_v41 = vrot.slane %v1697_v24, 4  ;;  %v1673_v9 = vor.u32 %v1672_v33, %v1669_v10  ;;  %v1654_v24 = vrot.slane %v1652_v48, 5  ;;  %v1628_v10 = vshll.u32 %v3726_v63, 16 }
  0xdd   : > { %v1852_v2 = vsel %vm490_vm2, %v2454_v12, 0  ;;  %v1684_v20 = vrot.slane %v1683_v13, 4  ;;  %v1632_v33 = vshrl.u32 %v3726_v63, 16  ;;  %v1638_v13 = vshll.u32 %v3729_v6, 16 }
  0xde   : > { %v1703_v38 = vsel %vm2968_vm4, %v1698_v41, %v1702_v56  ;;  %v1674_v56 = vrot.slane %v1673_v9, 4  ;;  %v1619_v41 = vshrl.u32 %v2425_v43, 16  ;;  %v1539_v9 = vsel %vm490_vm2, %v2814_v35, 0 }
  0xdf   : > { %2667 = vmatmul.mubr.msk.bf16.vlgmr.msra.gmra.mxu0 %vm490_vm2, %v2361_v23  ;;  %v1708_v23 = vrot.slane %v1707_v5, 4  ;;  %v1658_v5 = vrot.slane %v1656_v55, 4  ;;  %v1634_v39 = vrot.slane %v1632_v33, 4  ;;  %v1640_v6 = vrot.slane %v1638_v13, 5 }
  0xe0   : > { %2691 = vmatpush3.bf16.xpose.msra.mxu0 %v1551_v29  ;;  %2713 = vmatpush3.bf16.xpose.msra.mxu1 %v1858_v49  ;;  %v2428_v29 = vld [vmem:[%s2942_s8 + $0x24] sm:$0xf]  ;;  %v1545_v49 = vsel %vm490_vm2, %v2812_v58, 0  ;;  %v1679_v45 = vsel %vm2968_vm4, %v1674_v56, %v1678_v19  ;;  %v1689_v58 = vsel %vm2968_vm4, %v1684_v20, %v1688_v53 }
  0xe1   : > { %2692 = vmatprep.subr.bf16.mxu0 %v2858_v0  ;;  %2714 = vmatprep.subr.bf16.mxu1 %v2858_v0  ;;  %v1713_v22 = vsel %vm2968_vm4, %v1708_v23, %v1712_v15  ;;  %v1643_v62 = vshrl.u32 %v2428_v29, 16  ;;  %v1646_v34 = vshll.u32 %v2428_v29, 16  ;;  %v1659_v23 = vor.u32 %v1658_v5, %v1654_v24  ;;  %v2816_v5 = vld [vmem:[%s2942_s8 + $0x24] sm:$0xff]  }
  0xe2   : > { %2706 = vmatprep.mubr.msk.bf16.mxu0 %vm2859_vm0, %v2858_v0  ;;  %v1622_v15 = vshll.u32 %v2425_v43, 16  ;;  %v2452_v11 = vcombine.low %v1679_v45, %v1689_v58  ;;  %v1664_v29 = vrot.slane %v1662_v42, 5  ;;  %v2817_v42 = vld [vmem:[%s2942_s8 + $0x18] sm:$0xff]  }
  0xe3   : > { %v1645_v28 = vrot.slane %v1643_v62, 4  ;;  %v1648_v14 = vrot.slane %v1646_v34, 5  ;;  %v1530_v45 = vsel %vm490_vm2, %v2817_v42, 0 }
  0xe4   : > { %v1846_v63 = vsel %vm490_vm2, %v2452_v11, 0 }
  0xe5   : > { %v1649_v12 = vor.u32 %v1648_v14, %v1645_v28 }
  0xe7   : > { %v1650_v19 = vrot.slane %v1649_v12, 4 }
  0xe8   : > { %2693 = vmatpush3.bf16.xpose.msra.mxu0 %v1548_v51  ;;  %2715 = vmatpush3.bf16.xpose.msra.mxu1 %v1855_v47  ;;  %v2813_v51 = vld [vmem:[%s2942_s8 + $0x48] sm:$0xff]   ;;  %v2453_v47 = vcombine.low %v1703_v38, %v1713_v22  ;;  %v1624_v38 = vrot.slane %v1622_v15, 5  ;;  %v1630_v22 = vrot.slane %v1628_v10, 5  ;;  %v2043_v15 = vsel %vm490_vm2, %v2483_v27, 0 }
  0xe9   : > { %2694 = vmatprep.subr.bf16.mxu0 %v2858_v0  ;;  %2716 = vmatprep.subr.bf16.mxu1 %v2858_v0  ;;  %v1542_v59 = vsel %vm490_vm2, %v2813_v51, 0  ;;  %v1655_v62 = vsel %vm2968_vm4, %v1650_v19, %v1654_v24  ;;  %v2815_v51 = vld [vmem:[%s2942_s8 + $0x30] sm:$0xff]   ;;  %v2034_v27 = vsel %vm490_vm2, %v2480_v60, 0 }
  0xea   : > { %v1849_v1 = vsel %vm490_vm2, %v2453_v47, 0  ;;  %v1635_v55 = vor.u32 %v1634_v39, %v1630_v22  ;;  %v1536_v20 = vsel %vm490_vm2, %v2815_v51, 0 }
  0xec   : > { %v1636_v56 = vrot.slane %v1635_v55, 4 }
  0xee   : > { %v1641_v24 = vsel %vm2968_vm4, %v1636_v56, %v1640_v6 }
  0xf0   : > { %2695 = vmatpush3.bf16.xpose.msra.mxu0 %v1545_v49  ;;  %2717 = vmatpush3.bf16.xpose.msra.mxu1 %v1852_v2  ;;  %v1621_v49 = vrot.slane %v1619_v41, 4  ;;  %v1660_v2 = vrot.slane %v1659_v23, 4  ;;  %v2415_v23 = vld [vmem:[%s3932_s1 + $0x18] sm:$0xf] }
  0xf1   : > { %2696 = vmatprep.subr.bf16.mxu0 %v2858_v0  ;;  %2718 = vmatprep.subr.bf16.mxu1 %v2858_v0 }
  0xf2   : > { %v1665_v34 = vsel %vm2968_vm4, %v1660_v2, %v1664_v29  ;;  %v1625_v48 = vor.u32 %v1624_v38, %v1621_v49 }
  0xf3   : > { %v2451_v47 = vcombine.low %v1655_v62, %v1665_v34 }
  0xf4   : > { %v1626_v53 = vrot.slane %v1625_v48, 4 }
  0xf5   : > { %v1843_v28 = vsel %vm490_vm2, %v2451_v47, 0 }
  0xf6   : > { %v1631_v14 = vsel %vm2968_vm4, %v1626_v53, %v1630_v22 }
  0xf7   : > { %v2450_v43 = vcombine.low %v1631_v14, %v1641_v24 }
  0xf8   : > { %2697 = vmatpush3.bf16.xpose.msra.mxu0 %v1542_v59  ;;  %2719 = vmatpush3.bf16.xpose.msra.mxu1 %v1849_v1  ;;  %v1533_v59 = vsel %vm490_vm2, %v2816_v5, 0 }
  0xf9   : > { %2698 = vmatprep.subr.bf16.mxu0 %v2858_v0  ;;  %2720 = vmatprep.subr.bf16.mxu1 %v2858_v0  ;;  %v1840_v1 = vsel %vm490_vm2, %v2450_v43, 0 }
 0x100   : > { %2699 = vmatpush3.bf16.xpose.msra.mxu0 %v1539_v9  ;;  %2721 = vmatpush3.bf16.xpose.msra.mxu1 %v1846_v63 }
 0x101   : > { %2700 = vmatprep.subr.bf16.mxu0 %v2858_v0  ;;  %2722 = vmatprep.subr.bf16.mxu1 %v2858_v0 }
 0x108   : > { %2701 = vmatpush3.bf16.xpose.msra.mxu0 %v1536_v20  ;;  %2723 = vmatpush3.bf16.xpose.msra.mxu1 %v1843_v28 }
 0x109   : > { %2702 = vmatprep.subr.bf16.mxu0 %v2858_v0  ;;  %2724 = vmatprep.subr.bf16.mxu1 %v2858_v0 }
 0x110   : > { %2703 = vmatpush3.bf16.xpose.msra.mxu0 %v1533_v59  ;;  %2725 = vmatpush3.bf16.xpose.msra.mxu1 %v1840_v1 }
 0x111   : > { %2704 = vmatprep.subr.bf16.mxu0 %v2858_v0 }
 0x117   : > { %v659_v58 = vpop.f32.mrf.mxu1  ;;  %2727 = vmatmul.mubr.msk.bf16.vlgmr.msra.gmra.mxu1 %vm490_vm2, %v2449_v26 }
 0x118   : > { %2705 = vmatpush3.bf16.xpose.msra.mxu0 %v1530_v45 }
 0x119   : > { %2730 = vmatprep.subr.bf16.mxu0 %v2858_v0  ;;  %v2608_v12 = vpop.f32.mrf.mxu1 }
 0x11b   : > { %v662_v41 = vpop.f32.mrf.mxu1 }
 0x11d   : > { %v2609_v10 = vpop.f32.mrf.mxu1 }
 0x11f   : > { %v552_v33 = vpop.f32.mrf.mxu0  ;;  %2707 = vmatmul.mubr.msk.bf16.vlgmr.msra.gmra.mxu0 %vm490_vm2, %v2415_v23 }
 0x120   : > { %v660_v35 = vadd.f32 %v659_v58, %v552_v33  ;;  %2731 = vmatpush3.bf16.xpose.msra.mxu0 %v2043_v15  ;;  %2746 = vmatprep.mubr.msk.bf16.mxu0 %vm2859_vm0, %v2858_v0 }
 0x121   : > { %v2588_v11 = vpop.f32.mrf.mxu0  ;;  %2732 = vmatprep.subr.bf16.mxu0 %v2858_v0 }
 0x123   : > { %v555_v19 = vpop.f32.mrf.mxu0 }
 0x125   : > { %v2589_v29 = vpop.f32.mrf.mxu0 }
 0x128   : > { %2733 = vmatpush3.bf16.xpose.msra.mxu0 %v2040_v25 }
 0x129   : > { %2734 = vmatprep.subr.bf16.mxu0 %v2858_v0 }
 0x130   : > { %2735 = vmatpush3.bf16.xpose.msra.mxu0 %v2037_v61 }
 0x131   : > { %2736 = vmatprep.subr.bf16.mxu0 %v2858_v0 }
 0x138   : > { %2737 = vmatpush3.bf16.xpose.msra.mxu0 %v2034_v27 }
 0x139   : > { %2738 = vmatprep.subr.bf16.mxu0 %v2858_v0 }
 0x140   : > { %2739 = vmatpush3.bf16.xpose.msra.mxu0 %v2031_v50 }
 0x141   : > { %2740 = vmatprep.subr.bf16.mxu0 %v2858_v0 }
 0x148   : > { %2741 = vmatpush3.bf16.xpose.msra.mxu0 %v2028_v30 }
 0x149   : > { %2742 = vmatprep.subr.bf16.mxu0 %v2858_v0 }
 0x150   : > { %2743 = vmatpush3.bf16.xpose.msra.mxu0 %v2025_v7 }
 0x151   : > { %2744 = vmatprep.subr.bf16.mxu0 %v2858_v0 }
 0x157   : > { %v965_v4 = vpop.f32.mrf.mxu1 }
 0x158   : > { %2745 = vmatpush3.bf16.xpose.msra.mxu0 %v2022_v8 }
 0x159   : > { %v2648_v37 = vpop.f32.mrf.mxu1 }
 0x15b   : > { %v968_v17 = vpop.f32.mrf.mxu1 }
 0x15d   : > { %v2649_v60 = vpop.f32.mrf.mxu1 }
 0x15f   : > { %v835_v3 = vpop.f32.mrf.mxu0  ;;  %2747 = vmatmul.mubr.msk.bf16.vlgmr.msra.gmra.mxu0 %vm490_vm2, %v2475_v52 }
 0x160   : > { %v841_v16 = vadd.f32 %v835_v3, %v660_v35 }
 0x161   : > { %v2628_v40 = vpop.f32.mrf.mxu0 }
 0x162   : > { %v971_v0 = vadd.f32 %v965_v4, %v841_v16 }
 0x163   : > { %v838_v32 = vpop.f32.mrf.mxu0 }
 0x165   : > { %v2629_v57 = vpop.f32.mrf.mxu0 }
 0x197   : > { %v1457_v46 = vpop.f32.mrf.mxu1 }
 0x199   : > { %v2688_v31 = vpop.f32.mrf.mxu1 }
 0x19b   : > { %v1460_v44 = vpop.f32.mrf.mxu1 }
 0x19d   : > { %v2689_v21 = vpop.f32.mrf.mxu1 }
 0x19f   : > { %v1275_v54 = vpop.f32.mrf.mxu0 }
 0x1a0   : > { %v1281_v36 = vadd.f32 %v1275_v54, %v971_v0 }
 0x1a1   : > { %v2668_v18 = vpop.f32.mrf.mxu0 }
 0x1a2   : > { %v1463_v49 = vadd.f32 %v1457_v46, %v1281_v36 }
 0x1a3   : > { %v1278_v2 = vpop.f32.mrf.mxu0 }
 0x1a5   : > { %v2669_v38 = vpop.f32.mrf.mxu0 }
 0x1d7   : > { %v1897_v22 = vpop.f32.mrf.mxu1 }
 0x1d9   : > { %v2728_v39 = vpop.f32.mrf.mxu1 }
 0x1db   : > { %v1900_v9 = vpop.f32.mrf.mxu1 }
 0x1dd   : > { %v2729_v63 = vpop.f32.mrf.mxu1 }
 0x1df   : > { %v1587_v13 = vpop.f32.mrf.mxu0 }
 0x1e0   : > { %v1593_v62 = vadd.f32 %v1587_v13, %v1463_v49 }
 0x1e1   : > { %v2708_v34 = vpop.f32.mrf.mxu0 }
 0x1e2   : > { %v1903_v48 = vadd.f32 %v1897_v22, %v1593_v62 }
 0x1e3   : > { %v1590_v55 = vpop.f32.mrf.mxu0 }
 0x1e5   : > { %v2709_v51 = vpop.f32.mrf.mxu0 }
 0x21f   : > { %v2079_v47 = vpop.f32.mrf.mxu0 }
 0x220   : > { %v2085_v53 = vadd.f32 %v2079_v47, %v1903_v48 }
 0x221   : > { %v2748_v56 = vpop.f32.mrf.mxu0  ;;  %2091 = sbr.rel (%p2485_p7) target bundleno = 552 (0x228), region = 32 }
 0x222   : > { %v2086_v6 = vpack.c.bf16 %v2085_v53, %v2085_v53 }
 0x223   : > { %v2082_v20 = vpop.f32.mrf.mxu0 }
 0x224   : > { %2087 = vst [vmem:[%s230_s23] sm:$0xf] %v2086_v6 }
 0x225   : > { %v2749_v28 = vpop.f32.mrf.mxu0 }
 0x226   : > { %vm2092_vm8 = vcmask 7168   ;;  %v2860_v14 = vmov 0.0  }
 0x227   : > { %2093 = vst.msk [vmem:[%s2932_s27] sm:$0xff] %vm2092_vm8, %v2860_v14  ;;  %2094 = vst.msk [vmem:[%s2937_s30] sm:$0xff] %vm2092_vm8, %v2860_v14 }
 0x228 PF: > { %2096 = vadd.xlane.f32.xlu0 %v2085_v53  ;;  %v2102_v24 = vmul.f32 %v2085_v53, %v2085_v53  ;;  %vm2099_vm9 = vcmask 7168  }
 0x22c   : > { %2103 = vadd.xlane.f32.xlu0 %v2102_v24 }
 0x22e   : > { %v2095_v5 = vld [vmem:[%s2932_s27] sm:$0xff] }
 0x22f   : > { %v2101_v1 = vld [vmem:[%s2937_s30] sm:$0xff] }
 0x2b1   : > { %v2097_v43 = vpop.xlane.xlu0 %2096 }
 0x2b2   : > { %v2098_v59 = vadd.f32 %v2097_v43, %v2095_v5 }
 0x2b4   : > { %2100 = vst.msk [vmem:[%s2932_s27] sm:$0xff] %vm2099_vm9, %v2098_v59 }
 0x2b5   : > { %v2104_v42 = vpop.xlane.xlu0 %2103 }
 0x2b6   : > { %v2105_v26 = vadd.f32 %v2104_v42, %v2101_v1 }
 0x2b8   : > { %2106 = vst.msk [vmem:[%s2937_s30] sm:$0xff] %vm2099_vm9, %v2105_v26 }
 0x2b9 PF: > { %s15_s19 = sadd.s32 1, %s2856_s19   ;;  %s3940_s15 = smov %s2848_s17 }
 0x2ba   : > { %p12_p8 = scmp.ge.s32.totalorder %s15_s19, 6   ;;  %s3941_s16 = smov %s2852_s18 }
 0x2bb   : > { %s3942_s17 = smov %s3945_s20  ;;  %s3943_s18 = smov %s3949_s21 }
 0x2bc   :  { %14 = sbr.rel (!%p12_p8) target bundleno = 3 (0x3), region = 97 }

</bundles_post_ra>
